<compile_context>
chip_gen: v6e
topology: v6e:2x2x1
jax: 0.10.0
libtpu: 0.0.40
codegen_flags: <defaults>
</compile_context>

<pallas_src>
import math

import jax
import jax.numpy as jnp
from jax.experimental import pallas as pl
from jax.experimental.pallas import tpu as pltpu

# ---------------- small synthetic DistilBERT config ----------------
VOCAB = 100
MAX_POS = 32
HIDDEN = 64
NUM_HEADS = 4
HEAD_DIM = HIDDEN // NUM_HEADS
FFN = 128
NUM_LAYERS = 2
NUM_CATEGORIES = 3
NUM_SUBCATEGORIES = 5
NUM_LABELS = NUM_CATEGORIES + NUM_SUBCATEGORIES
LN_EPS = 1e-12          # NOTE: keep LN math in f32 (this eps underflows in bf16)
LANE = 128              # lane-dense padded label dim for the output slab

BATCH = 2
SEQ = 8

# rows of the packed per-layer (L, 9, H) bias/LN slab
_BQ, _BK, _BV, _BO, _LN1G, _LN1B, _B2, _LN2G, _LN2B = range(9)


# ---------------- in-kernel math helpers ----------------
def _layer_norm_2d(x, gamma, beta):
    # x: (N, H) f32; gamma/beta: (1, H) f32
    mean = jnp.mean(x, axis=-1, keepdims=True)
    var = jnp.mean((x - mean) * (x - mean), axis=-1, keepdims=True)
    inv = jax.lax.rsqrt(var + LN_EPS)
    return (x - mean) * inv * gamma + beta


def _erf_approx(x):
    # Abramowitz & Stegun 7.1.26 rational approximation of erf (|abs err| < 1.5e-7).
    # Uses only exp / mul / add / where, which all have solid Mosaic lowerings.
    a1, a2, a3, a4, a5 = 0.254829592, -0.284496736, 1.421413741, -1.453152027, 1.061405429
    p = 0.3275911
    ax = jnp.abs(x)
    t = 1.0 / (1.0 + p * ax)
    poly = ((((a5 * t + a4) * t + a3) * t + a2) * t + a1) * t
    y = 1.0 - poly * jnp.exp(-ax * ax)
    return jnp.where(x < 0.0, -y, y)


def _gelu_exact(x):
    # HF DistilBERT uses exact (erf) GELU; lax.erf has no guaranteed Mosaic lowering, so use
    # the high-accuracy rational erf above.
    return 0.5 * x * (1.0 + _erf_approx(x * (1.0 / math.sqrt(2.0))))


# ---------------- fully fused forward kernel (no grid; layers statically unrolled) ----------------
def fused_forward_kernel(
        emb_ref, emb_ln_ref,
        w_qkv_ref, w_o_ref, w1_ref, w2_ref, vec_ref, b1_ref,
        pre_w_ref, pre_b_ref, cls_w_ref, cls_b_ref,
        logits_ref):
    H = HIDDEN
    scale = 1.0 / math.sqrt(HEAD_DIM)

    # ---- embedding LayerNorm ----
    emb_ln = emb_ln_ref[...]                               # (2, H) f32: [gamma; beta]
    x = _layer_norm_2d(emb_ref[...], emb_ln[0:1, :], emb_ln[1:2, :])   # (B*S, H) f32

    # ---- encoder layers, statically unrolled; hidden state stays resident in VMEM/vregs ----
    for layer in range(NUM_LAYERS):
        w_qkv = w_qkv_ref[layer]                           # (H, 3H) bf16
        w_o = w_o_ref[layer]                               # (H, H)  bf16
        w1 = w1_ref[layer]                                 # (H, F)  bf16
        w2 = w2_ref[layer]                                 # (F, H)  bf16
        vec = vec_ref[layer]                               # (9, H)  f32 (biases + LN params)
        b1 = b1_ref[layer]                                 # (1, F)  f32

        # fused QKV projection: one MXU dot instead of three
        xb = x.astype(jnp.bfloat16)
        qkv = jnp.dot(xb, w_qkv, preferred_element_type=jnp.float32)   # (B*S, 3H) f32
        q = (qkv[:, 0:H] + vec[_BQ:_BQ + 1, :]).astype(jnp.bfloat16).reshape(BATCH, SEQ, H)
        k = (qkv[:, H:2 * H] + vec[_BK:_BK + 1, :]).astype(jnp.bfloat16).reshape(BATCH, SEQ, H)
        v = (qkv[:, 2 * H:3 * H] + vec[_BV:_BV + 1, :]).astype(jnp.bfloat16).reshape(BATCH, SEQ, H)

        # per-head attention (static unroll); bf16 MXU operands, f32 softmax statistics
        ctx_parts = []
        for h in range(NUM_HEADS):
            sl = slice(h * HEAD_DIM, (h + 1) * HEAD_DIM)
            qh, kh, vh = q[:, :, sl], k[:, :, sl], v[:, :, sl]
            s = jnp.einsum('bqd,bkd->bqk', qh, kh,
                           preferred_element_type=jnp.float32) * scale        # (B, S, S) f32
            s = s - jnp.max(s, axis=-1, keepdims=True)
            p = jnp.exp(s)
            p = p * pl.reciprocal(jnp.sum(p, axis=-1, keepdims=True), approx=True)
            ctx = jnp.einsum('bqk,bkd->bqd', p.astype(jnp.bfloat16), vh,
                             preferred_element_type=jnp.float32)              # (B, S, dH) f32
            ctx_parts.append(ctx.reshape(BATCH * SEQ, HEAD_DIM))
        # single fused output projection over all heads (lane concat is XLU work, overlaps MXU)
        ctx_all = jnp.concatenate(ctx_parts, axis=-1).astype(jnp.bfloat16)    # (B*S, H) bf16
        attn = jnp.dot(ctx_all, w_o,
                       preferred_element_type=jnp.float32) + vec[_BO:_BO + 1, :]

        h1 = _layer_norm_2d(x + attn, vec[_LN1G:_LN1G + 1, :], vec[_LN1B:_LN1B + 1, :])

        # feed-forward
        ff = jnp.dot(h1.astype(jnp.bfloat16), w1, preferred_element_type=jnp.float32) + b1
        ff = _gelu_exact(ff)
        ff = jnp.dot(ff.astype(jnp.bfloat16), w2,
                     preferred_element_type=jnp.float32) + vec[_B2:_B2 + 1, :]
        x = _layer_norm_2d(h1 + ff, vec[_LN2G:_LN2G + 1, :], vec[_LN2B:_LN2B + 1, :])

    # ---- classification head (bf16 operands, f32 accumulation); computed for all tokens so the
    #      store stays lane/sublane dense; the wrapper keeps only the CLS rows ----
    pre = jnp.dot(x.astype(jnp.bfloat16), pre_w_ref[...],
                  preferred_element_type=jnp.float32) + pre_b_ref[...]
    pre = jnp.maximum(pre, 0.0)                            # ReLU
    logits_ref[...] = jnp.dot(pre.astype(jnp.bfloat16), cls_w_ref[...],
                              preferred_element_type=jnp.float32) + cls_b_ref[...]


# ---------------- params ----------------
def init_params(key):
    def nrm(k, shape, std=0.02, dtype=jnp.float32):
        return (jax.random.normal(k, shape, jnp.float32) * std).astype(dtype)

    ks = jax.random.split(key, 8)
    L, H, F = NUM_LAYERS, HIDDEN, FFN
    bf16 = jnp.bfloat16

    # packed per-layer bias / LN slab: rows = [bq, bk, bv, bo, ln1_g, ln1_b, b2, ln2_g, ln2_b]
    vec = jnp.zeros((L, 9, H), jnp.float32)
    vec = vec.at[:, _LN1G, :].set(1.0)
    vec = vec.at[:, _LN2G, :].set(1.0)

    return {
        "word_emb": nrm(ks[0], (VOCAB, H)),
        "pos_emb": nrm(ks[1], (MAX_POS, H)),
        # embedding LayerNorm packed as [gamma; beta]
        "emb_ln": jnp.concatenate([jnp.ones((1, H), jnp.float32),
                                   jnp.zeros((1, H), jnp.float32)], axis=0),
        # MXU operands stored in bf16; biases / LN params stay f32.
        "w_qkv": nrm(ks[2], (L, H, 3 * H), dtype=bf16),    # wq | wk | wv fused along lanes
        "w_o": nrm(ks[3], (L, H, H), dtype=bf16),
        "w1": nrm(ks[4], (L, H, F), dtype=bf16),
        "w2": nrm(ks[5], (L, F, H), dtype=bf16),
        "vec": vec,
        "b1": jnp.zeros((L, 1, F), jnp.float32),
        "pre_w": nrm(ks[6], (H, H), dtype=bf16),
        "pre_b": jnp.zeros((1, H), jnp.float32),
        "cls_w": nrm(ks[7], (H, NUM_LABELS)),
        "cls_b": jnp.zeros((1, NUM_LABELS), jnp.float32),
    }


# ---------------- wrapper ----------------
@jax.jit
def distilbert_forward(params, input_ids):
    B, S = input_ids.shape
    assert (B, S) == (BATCH, SEQ)

    # embeddings: gather + positional add in XLA, LayerNorm inside the fused kernel
    emb = jnp.take(params["word_emb"], input_ids, axis=0) + params["pos_emb"][:S][None, :, :]
    emb = emb.reshape(B * S, HIDDEN).astype(jnp.float32)

    # pad classifier to a lane-dense (H, 128) / (1, 128) so the kernel output is unmasked
    cls_w_pad = jnp.pad(params["cls_w"],
                        ((0, 0), (0, LANE - NUM_LABELS))).astype(jnp.bfloat16)
    cls_b_pad = jnp.pad(params["cls_b"], ((0, 0), (0, LANE - NUM_LABELS)))

    vmem = pl.BlockSpec(memory_space=pltpu.MemorySpace.VMEM)   # whole array resident in VMEM
    logits_pad = pl.pallas_call(
        fused_forward_kernel,
        out_shape=jax.ShapeDtypeStruct((B * S, LANE), jnp.float32),
        in_specs=[vmem] * 12,
        out_specs=vmem,
    )(emb, params["emb_ln"],
      params["w_qkv"], params["w_o"], params["w1"], params["w2"],
      params["vec"], params["b1"],
      params["pre_w"], params["pre_b"], cls_w_pad, cls_b_pad)

    # keep only the CLS token rows and the real label columns, then split
    logits = logits_pad.reshape(B, S, LANE)[:, 0, :NUM_LABELS]
    category_logits = logits[:, :NUM_CATEGORIES]
    subcategory_logits = logits[:, NUM_CATEGORIES:]
    return category_logits, subcategory_logits


if __name__ == "__main__":
    key = jax.random.PRNGKey(0)
    pkey, dkey = jax.random.split(key)
    params = init_params(pkey)
    input_ids = jax.random.randint(dkey, (BATCH, SEQ), 0, VOCAB, dtype=jnp.int32)

    cat_logits, subcat_logits = distilbert_forward(params, input_ids)
    jax.block_until_ready((cat_logits, subcat_logits))

    assert cat_logits.shape == (BATCH, NUM_CATEGORIES)
    assert subcat_logits.shape == (BATCH, NUM_SUBCATEGORIES)
    assert bool(jnp.all(jnp.isfinite(cat_logits))) and bool(jnp.all(jnp.isfinite(subcat_logits)))
    print("KERNEL_OK")
</pallas_src>

<mosaic_0001>
module attributes {stable_mosaic.version = 11 : i64} {
  func.func @fused_forward_kernel(%arg0: memref<16x64xf32, #tpu.memory_space<vmem>>, %arg1: memref<2x64xf32, #tpu.memory_space<vmem>>, %arg2: memref<2x64x192xbf16, #tpu.memory_space<vmem>>, %arg3: memref<2x64x64xbf16, #tpu.memory_space<vmem>>, %arg4: memref<2x64x128xbf16, #tpu.memory_space<vmem>>, %arg5: memref<2x128x64xbf16, #tpu.memory_space<vmem>>, %arg6: memref<2x9x64xf32, #tpu.memory_space<vmem>>, %arg7: memref<2x1x128xf32, #tpu.memory_space<vmem>>, %arg8: memref<64x64xbf16, #tpu.memory_space<vmem>>, %arg9: memref<1x64xf32, #tpu.memory_space<vmem>>, %arg10: memref<64x128xbf16, #tpu.memory_space<vmem>>, %arg11: memref<1x128xf32, #tpu.memory_space<vmem>>, %arg12: memref<16x128xf32, #tpu.memory_space<vmem>>) attributes {dimension_semantics = [], scalar_prefetch = 0 : i64, scratch_operands = 0 : i64, tpu.core_type = #tpu.core_type<tc>} {
    %c0 = arith.constant 0 : index
    %c0_0 = arith.constant 0 : index
    %0 = vector.load %arg1[%c0, %c0_0] : memref<2x64xf32, #tpu.memory_space<vmem>>, vector<2x64xf32>
    %c0_1 = arith.constant 0 : index
    %c0_2 = arith.constant 0 : index
    %1 = vector.load %arg0[%c0_1, %c0_2] : memref<16x64xf32, #tpu.memory_space<vmem>>, vector<16x64xf32>
    %2 = vector.extract_strided_slice %0 {offsets = [0, 0], sizes = [1, 64], strides = [1, 1]} : vector<2x64xf32> to vector<1x64xf32>
    %3 = vector.extract_strided_slice %0 {offsets = [1, 0], sizes = [1, 64], strides = [1, 1]} : vector<2x64xf32> to vector<1x64xf32>
    %cst = arith.constant dense<0.000000e+00> : vector<16xf32>
    %4 = vector.multi_reduction <add>, %1, %cst [1] : vector<16x64xf32> to vector<16xf32>
    %5 = vector.shape_cast %4 : vector<16xf32> to vector<16x1xf32>
    %cst_3 = arith.constant 6.400000e+01 : f32
    %6 = vector.broadcast %cst_3 : f32 to vector<16x1xf32>
    %7 = arith.divf %5, %6 : vector<16x1xf32>
    %8 = vector.broadcast %7 : vector<16x1xf32> to vector<16x64xf32>
    %9 = arith.subf %1, %8 : vector<16x64xf32>
    %10 = vector.broadcast %7 : vector<16x1xf32> to vector<16x64xf32>
    %11 = arith.subf %1, %10 : vector<16x64xf32>
    %12 = arith.mulf %9, %11 : vector<16x64xf32>
    %cst_4 = arith.constant dense<0.000000e+00> : vector<16xf32>
    %13 = vector.multi_reduction <add>, %12, %cst_4 [1] : vector<16x64xf32> to vector<16xf32>
    %14 = vector.shape_cast %13 : vector<16xf32> to vector<16x1xf32>
    %cst_5 = arith.constant 6.400000e+01 : f32
    %15 = vector.broadcast %cst_5 : f32 to vector<16x1xf32>
    %16 = arith.divf %14, %15 : vector<16x1xf32>
    %cst_6 = arith.constant 9.99999996E-13 : f32
    %17 = vector.broadcast %cst_6 : f32 to vector<16x1xf32>
    %18 = arith.addf %16, %17 : vector<16x1xf32>
    %19 = math.rsqrt %18 : vector<16x1xf32>
    %20 = vector.broadcast %7 : vector<16x1xf32> to vector<16x64xf32>
    %21 = arith.subf %1, %20 : vector<16x64xf32>
    %22 = vector.broadcast %19 : vector<16x1xf32> to vector<16x64xf32>
    %23 = arith.mulf %21, %22 : vector<16x64xf32>
    %24 = vector.broadcast %2 : vector<1x64xf32> to vector<16x64xf32>
    %25 = arith.mulf %23, %24 : vector<16x64xf32>
    %26 = vector.broadcast %3 : vector<1x64xf32> to vector<16x64xf32>
    %27 = arith.addf %25, %26 : vector<16x64xf32>
    %c0_7 = arith.constant 0 : index
    %c0_8 = arith.constant 0 : index
    %c0_9 = arith.constant 0 : index
    %28 = vector.load %arg2[%c0_7, %c0_8, %c0_9] : memref<2x64x192xbf16, #tpu.memory_space<vmem>>, vector<1x64x192xbf16>
    %29 = vector.shape_cast %28 : vector<1x64x192xbf16> to vector<64x192xbf16>
    %c0_10 = arith.constant 0 : index
    %c0_11 = arith.constant 0 : index
    %c0_12 = arith.constant 0 : index
    %30 = vector.load %arg3[%c0_10, %c0_11, %c0_12] : memref<2x64x64xbf16, #tpu.memory_space<vmem>>, vector<1x64x64xbf16>
    %31 = vector.shape_cast %30 : vector<1x64x64xbf16> to vector<64x64xbf16>
    %c0_13 = arith.constant 0 : index
    %c0_14 = arith.constant 0 : index
    %c0_15 = arith.constant 0 : index
    %32 = vector.load %arg4[%c0_13, %c0_14, %c0_15] : memref<2x64x128xbf16, #tpu.memory_space<vmem>>, vector<1x64x128xbf16>
    %33 = vector.shape_cast %32 : vector<1x64x128xbf16> to vector<64x128xbf16>
    %c0_16 = arith.constant 0 : index
    %c0_17 = arith.constant 0 : index
    %c0_18 = arith.constant 0 : index
    %34 = vector.load %arg5[%c0_16, %c0_17, %c0_18] : memref<2x128x64xbf16, #tpu.memory_space<vmem>>, vector<1x128x64xbf16>
    %35 = vector.shape_cast %34 : vector<1x128x64xbf16> to vector<128x64xbf16>
    %c0_19 = arith.constant 0 : index
    %c0_20 = arith.constant 0 : index
    %c0_21 = arith.constant 0 : index
    %36 = vector.load %arg6[%c0_19, %c0_20, %c0_21] : memref<2x9x64xf32, #tpu.memory_space<vmem>>, vector<1x9x64xf32>
    %37 = vector.shape_cast %36 : vector<1x9x64xf32> to vector<9x64xf32>
    %c0_22 = arith.constant 0 : index
    %c0_23 = arith.constant 0 : index
    %c0_24 = arith.constant 0 : index
    %38 = vector.load %arg7[%c0_22, %c0_23, %c0_24] : memref<2x1x128xf32, #tpu.memory_space<vmem>>, vector<1x1x128xf32>
    %39 = vector.shape_cast %38 : vector<1x1x128xf32> to vector<1x128xf32>
    %40 = arith.truncf %27 : vector<16x64xf32> to vector<16x64xbf16>
    %cst_25 = arith.constant dense<0.000000e+00> : vector<16x192xf32>
    %41 = tpu.matmul %40, %29, %cst_25 {dimension_numbers = #tpu.dot_dimension_numbers<[1], [0], [0], [1], [0, 0, 1, 1], [], []>} : vector<16x64xbf16>, vector<64x192xbf16>, vector<16x192xf32> -> vector<16x192xf32>
    %42 = vector.extract_strided_slice %41 {offsets = [0, 0], sizes = [16, 64], strides = [1, 1]} : vector<16x192xf32> to vector<16x64xf32>
    %43 = vector.extract_strided_slice %37 {offsets = [0, 0], sizes = [1, 64], strides = [1, 1]} : vector<9x64xf32> to vector<1x64xf32>
    %44 = vector.broadcast %43 : vector<1x64xf32> to vector<16x64xf32>
    %45 = arith.addf %42, %44 : vector<16x64xf32>
    %46 = arith.truncf %45 : vector<16x64xf32> to vector<16x64xbf16>
    %47 = vector.shape_cast %46 : vector<16x64xbf16> to vector<2x8x64xbf16>
    %48 = vector.extract_strided_slice %41 {offsets = [0, 64], sizes = [16, 64], strides = [1, 1]} : vector<16x192xf32> to vector<16x64xf32>
    %49 = vector.extract_strided_slice %37 {offsets = [1, 0], sizes = [1, 64], strides = [1, 1]} : vector<9x64xf32> to vector<1x64xf32>
    %50 = vector.broadcast %49 : vector<1x64xf32> to vector<16x64xf32>
    %51 = arith.addf %48, %50 : vector<16x64xf32>
    %52 = arith.truncf %51 : vector<16x64xf32> to vector<16x64xbf16>
    %53 = vector.shape_cast %52 : vector<16x64xbf16> to vector<2x8x64xbf16>
    %54 = vector.extract_strided_slice %41 {offsets = [0, 128], sizes = [16, 64], strides = [1, 1]} : vector<16x192xf32> to vector<16x64xf32>
    %55 = vector.extract_strided_slice %37 {offsets = [2, 0], sizes = [1, 64], strides = [1, 1]} : vector<9x64xf32> to vector<1x64xf32>
    %56 = vector.broadcast %55 : vector<1x64xf32> to vector<16x64xf32>
    %57 = arith.addf %54, %56 : vector<16x64xf32>
    %58 = arith.truncf %57 : vector<16x64xf32> to vector<16x64xbf16>
    %59 = vector.shape_cast %58 : vector<16x64xbf16> to vector<2x8x64xbf16>
    %60 = vector.extract_strided_slice %47 {offsets = [0, 0, 0], sizes = [2, 8, 16], strides = [1, 1, 1]} : vector<2x8x64xbf16> to vector<2x8x16xbf16>
    %61 = vector.extract_strided_slice %53 {offsets = [0, 0, 0], sizes = [2, 8, 16], strides = [1, 1, 1]} : vector<2x8x64xbf16> to vector<2x8x16xbf16>
    %62 = vector.extract_strided_slice %59 {offsets = [0, 0, 0], sizes = [2, 8, 16], strides = [1, 1, 1]} : vector<2x8x64xbf16> to vector<2x8x16xbf16>
    "tpu.trace_start"() <{level = 10 : i32, message = "bqd,bkd->bqk"}> : () -> ()
    %cst_26 = arith.constant dense<0.000000e+00> : vector<2x8x8xf32>
    %63 = tpu.matmul %60, %61, %cst_26 {dimension_numbers = #tpu.dot_dimension_numbers<[2], [2], [1], [1], [0, 0, 0, 1, 1, 1], [0], [0]>} : vector<2x8x16xbf16>, vector<2x8x16xbf16>, vector<2x8x8xf32> -> vector<2x8x8xf32>
    "tpu.trace_stop"() : () -> ()
    %cst_27 = arith.constant 2.500000e-01 : f32
    %64 = vector.broadcast %cst_27 : f32 to vector<2x8x8xf32>
    %65 = arith.mulf %63, %64 : vector<2x8x8xf32>
    %cst_28 = arith.constant dense<0xFF800000> : vector<2x8xf32>
    %66 = vector.multi_reduction <maximumf>, %65, %cst_28 [2] : vector<2x8x8xf32> to vector<2x8xf32>
    %67 = vector.shape_cast %66 : vector<2x8xf32> to vector<2x8x1xf32>
    %68 = vector.broadcast %67 : vector<2x8x1xf32> to vector<2x8x8xf32>
    %69 = arith.subf %65, %68 : vector<2x8x8xf32>
    %70 = math.exp %69 : vector<2x8x8xf32>
    %cst_29 = arith.constant dense<0.000000e+00> : vector<2x8xf32>
    %71 = vector.multi_reduction <add>, %70, %cst_29 [2] : vector<2x8x8xf32> to vector<2x8xf32>
    %72 = vector.shape_cast %71 : vector<2x8xf32> to vector<2x8x1xf32>
    %73 = tpu.reciprocal %72 {approx = true} : vector<2x8x1xf32> -> vector<2x8x1xf32>
    %74 = vector.broadcast %73 : vector<2x8x1xf32> to vector<2x8x8xf32>
    %75 = arith.mulf %70, %74 : vector<2x8x8xf32>
    %76 = arith.truncf %75 : vector<2x8x8xf32> to vector<2x8x8xbf16>
    "tpu.trace_start"() <{level = 10 : i32, message = "bqk,bkd->bqd"}> : () -> ()
    %cst_30 = arith.constant dense<0.000000e+00> : vector<2x8x16xf32>
    %77 = tpu.matmul %76, %62, %cst_30 {dimension_numbers = #tpu.dot_dimension_numbers<[2], [1], [1], [2], [0, 0, 0, 1, 1, 2], [0], [0]>} : vector<2x8x8xbf16>, vector<2x8x16xbf16>, vector<2x8x16xf32> -> vector<2x8x16xf32>
    "tpu.trace_stop"() : () -> ()
    %78 = vector.shape_cast %77 : vector<2x8x16xf32> to vector<16x16xf32>
    %79 = vector.extract_strided_slice %47 {offsets = [0, 0, 16], sizes = [2, 8, 16], strides = [1, 1, 1]} : vector<2x8x64xbf16> to vector<2x8x16xbf16>
    %80 = vector.extract_strided_slice %53 {offsets = [0, 0, 16], sizes = [2, 8, 16], strides = [1, 1, 1]} : vector<2x8x64xbf16> to vector<2x8x16xbf16>
    %81 = vector.extract_strided_slice %59 {offsets = [0, 0, 16], sizes = [2, 8, 16], strides = [1, 1, 1]} : vector<2x8x64xbf16> to vector<2x8x16xbf16>
    "tpu.trace_start"() <{level = 10 : i32, message = "bqd,bkd->bqk"}> : () -> ()
    %cst_31 = arith.constant dense<0.000000e+00> : vector<2x8x8xf32>
    %82 = tpu.matmul %79, %80, %cst_31 {dimension_numbers = #tpu.dot_dimension_numbers<[2], [2], [1], [1], [0, 0, 0, 1, 1, 1], [0], [0]>} : vector<2x8x16xbf16>, vector<2x8x16xbf16>, vector<2x8x8xf32> -> vector<2x8x8xf32>
    "tpu.trace_stop"() : () -> ()
    %cst_32 = arith.constant 2.500000e-01 : f32
    %83 = vector.broadcast %cst_32 : f32 to vector<2x8x8xf32>
    %84 = arith.mulf %82, %83 : vector<2x8x8xf32>
    %cst_33 = arith.constant dense<0xFF800000> : vector<2x8xf32>
    %85 = vector.multi_reduction <maximumf>, %84, %cst_33 [2] : vector<2x8x8xf32> to vector<2x8xf32>
    %86 = vector.shape_cast %85 : vector<2x8xf32> to vector<2x8x1xf32>
    %87 = vector.broadcast %86 : vector<2x8x1xf32> to vector<2x8x8xf32>
    %88 = arith.subf %84, %87 : vector<2x8x8xf32>
    %89 = math.exp %88 : vector<2x8x8xf32>
    %cst_34 = arith.constant dense<0.000000e+00> : vector<2x8xf32>
    %90 = vector.multi_reduction <add>, %89, %cst_34 [2] : vector<2x8x8xf32> to vector<2x8xf32>
    %91 = vector.shape_cast %90 : vector<2x8xf32> to vector<2x8x1xf32>
    %92 = tpu.reciprocal %91 {approx = true} : vector<2x8x1xf32> -> vector<2x8x1xf32>
    %93 = vector.broadcast %92 : vector<2x8x1xf32> to vector<2x8x8xf32>
    %94 = arith.mulf %89, %93 : vector<2x8x8xf32>
    %95 = arith.truncf %94 : vector<2x8x8xf32> to vector<2x8x8xbf16>
    "tpu.trace_start"() <{level = 10 : i32, message = "bqk,bkd->bqd"}> : () -> ()
    %cst_35 = arith.constant dense<0.000000e+00> : vector<2x8x16xf32>
    %96 = tpu.matmul %95, %81, %cst_35 {dimension_numbers = #tpu.dot_dimension_numbers<[2], [1], [1], [2], [0, 0, 0, 1, 1, 2], [0], [0]>} : vector<2x8x8xbf16>, vector<2x8x16xbf16>, vector<2x8x16xf32> -> vector<2x8x16xf32>
    "tpu.trace_stop"() : () -> ()
    %97 = vector.shape_cast %96 : vector<2x8x16xf32> to vector<16x16xf32>
    %98 = vector.extract_strided_slice %47 {offsets = [0, 0, 32], sizes = [2, 8, 16], strides = [1, 1, 1]} : vector<2x8x64xbf16> to vector<2x8x16xbf16>
    %99 = vector.extract_strided_slice %53 {offsets = [0, 0, 32], sizes = [2, 8, 16], strides = [1, 1, 1]} : vector<2x8x64xbf16> to vector<2x8x16xbf16>
    %100 = vector.extract_strided_slice %59 {offsets = [0, 0, 32], sizes = [2, 8, 16], strides = [1, 1, 1]} : vector<2x8x64xbf16> to vector<2x8x16xbf16>
    "tpu.trace_start"() <{level = 10 : i32, message = "bqd,bkd->bqk"}> : () -> ()
    %cst_36 = arith.constant dense<0.000000e+00> : vector<2x8x8xf32>
    %101 = tpu.matmul %98, %99, %cst_36 {dimension_numbers = #tpu.dot_dimension_numbers<[2], [2], [1], [1], [0, 0, 0, 1, 1, 1], [0], [0]>} : vector<2x8x16xbf16>, vector<2x8x16xbf16>, vector<2x8x8xf32> -> vector<2x8x8xf32>
    "tpu.trace_stop"() : () -> ()
    %cst_37 = arith.constant 2.500000e-01 : f32
    %102 = vector.broadcast %cst_37 : f32 to vector<2x8x8xf32>
    %103 = arith.mulf %101, %102 : vector<2x8x8xf32>
    %cst_38 = arith.constant dense<0xFF800000> : vector<2x8xf32>
    %104 = vector.multi_reduction <maximumf>, %103, %cst_38 [2] : vector<2x8x8xf32> to vector<2x8xf32>
    %105 = vector.shape_cast %104 : vector<2x8xf32> to vector<2x8x1xf32>
    %106 = vector.broadcast %105 : vector<2x8x1xf32> to vector<2x8x8xf32>
    %107 = arith.subf %103, %106 : vector<2x8x8xf32>
    %108 = math.exp %107 : vector<2x8x8xf32>
    %cst_39 = arith.constant dense<0.000000e+00> : vector<2x8xf32>
    %109 = vector.multi_reduction <add>, %108, %cst_39 [2] : vector<2x8x8xf32> to vector<2x8xf32>
    %110 = vector.shape_cast %109 : vector<2x8xf32> to vector<2x8x1xf32>
    %111 = tpu.reciprocal %110 {approx = true} : vector<2x8x1xf32> -> vector<2x8x1xf32>
    %112 = vector.broadcast %111 : vector<2x8x1xf32> to vector<2x8x8xf32>
    %113 = arith.mulf %108, %112 : vector<2x8x8xf32>
    %114 = arith.truncf %113 : vector<2x8x8xf32> to vector<2x8x8xbf16>
    "tpu.trace_start"() <{level = 10 : i32, message = "bqk,bkd->bqd"}> : () -> ()
    %cst_40 = arith.constant dense<0.000000e+00> : vector<2x8x16xf32>
    %115 = tpu.matmul %114, %100, %cst_40 {dimension_numbers = #tpu.dot_dimension_numbers<[2], [1], [1], [2], [0, 0, 0, 1, 1, 2], [0], [0]>} : vector<2x8x8xbf16>, vector<2x8x16xbf16>, vector<2x8x16xf32> -> vector<2x8x16xf32>
    "tpu.trace_stop"() : () -> ()
    %116 = vector.shape_cast %115 : vector<2x8x16xf32> to vector<16x16xf32>
    %117 = vector.extract_strided_slice %47 {offsets = [0, 0, 48], sizes = [2, 8, 16], strides = [1, 1, 1]} : vector<2x8x64xbf16> to vector<2x8x16xbf16>
    %118 = vector.extract_strided_slice %53 {offsets = [0, 0, 48], sizes = [2, 8, 16], strides = [1, 1, 1]} : vector<2x8x64xbf16> to vector<2x8x16xbf16>
    %119 = vector.extract_strided_slice %59 {offsets = [0, 0, 48], sizes = [2, 8, 16], strides = [1, 1, 1]} : vector<2x8x64xbf16> to vector<2x8x16xbf16>
    "tpu.trace_start"() <{level = 10 : i32, message = "bqd,bkd->bqk"}> : () -> ()
    %cst_41 = arith.constant dense<0.000000e+00> : vector<2x8x8xf32>
    %120 = tpu.matmul %117, %118, %cst_41 {dimension_numbers = #tpu.dot_dimension_numbers<[2], [2], [1], [1], [0, 0, 0, 1, 1, 1], [0], [0]>} : vector<2x8x16xbf16>, vector<2x8x16xbf16>, vector<2x8x8xf32> -> vector<2x8x8xf32>
    "tpu.trace_stop"() : () -> ()
    %cst_42 = arith.constant 2.500000e-01 : f32
    %121 = vector.broadcast %cst_42 : f32 to vector<2x8x8xf32>
    %122 = arith.mulf %120, %121 : vector<2x8x8xf32>
    %cst_43 = arith.constant dense<0xFF800000> : vector<2x8xf32>
    %123 = vector.multi_reduction <maximumf>, %122, %cst_43 [2] : vector<2x8x8xf32> to vector<2x8xf32>
    %124 = vector.shape_cast %123 : vector<2x8xf32> to vector<2x8x1xf32>
    %125 = vector.broadcast %124 : vector<2x8x1xf32> to vector<2x8x8xf32>
    %126 = arith.subf %122, %125 : vector<2x8x8xf32>
    %127 = math.exp %126 : vector<2x8x8xf32>
    %cst_44 = arith.constant dense<0.000000e+00> : vector<2x8xf32>
    %128 = vector.multi_reduction <add>, %127, %cst_44 [2] : vector<2x8x8xf32> to vector<2x8xf32>
    %129 = vector.shape_cast %128 : vector<2x8xf32> to vector<2x8x1xf32>
    %130 = tpu.reciprocal %129 {approx = true} : vector<2x8x1xf32> -> vector<2x8x1xf32>
    %131 = vector.broadcast %130 : vector<2x8x1xf32> to vector<2x8x8xf32>
    %132 = arith.mulf %127, %131 : vector<2x8x8xf32>
    %133 = arith.truncf %132 : vector<2x8x8xf32> to vector<2x8x8xbf16>
    "tpu.trace_start"() <{level = 10 : i32, message = "bqk,bkd->bqd"}> : () -> ()
    %cst_45 = arith.constant dense<0.000000e+00> : vector<2x8x16xf32>
    %134 = tpu.matmul %133, %119, %cst_45 {dimension_numbers = #tpu.dot_dimension_numbers<[2], [1], [1], [2], [0, 0, 0, 1, 1, 2], [0], [0]>} : vector<2x8x8xbf16>, vector<2x8x16xbf16>, vector<2x8x16xf32> -> vector<2x8x16xf32>
    "tpu.trace_stop"() : () -> ()
    %135 = vector.shape_cast %134 : vector<2x8x16xf32> to vector<16x16xf32>
    %136 = tpu.concatenate %78, %97, %116, %135 in 1 : vector<16x16xf32>, vector<16x16xf32>, vector<16x16xf32>, vector<16x16xf32> -> vector<16x64xf32>
    %137 = arith.truncf %136 : vector<16x64xf32> to vector<16x64xbf16>
    %cst_46 = arith.constant dense<0.000000e+00> : vector<16x64xf32>
    %138 = tpu.matmul %137, %31, %cst_46 {dimension_numbers = #tpu.dot_dimension_numbers<[1], [0], [0], [1], [0, 0, 1, 1], [], []>} : vector<16x64xbf16>, vector<64x64xbf16>, vector<16x64xf32> -> vector<16x64xf32>
    %139 = vector.extract_strided_slice %37 {offsets = [3, 0], sizes = [1, 64], strides = [1, 1]} : vector<9x64xf32> to vector<1x64xf32>
    %140 = vector.broadcast %139 : vector<1x64xf32> to vector<16x64xf32>
    %141 = arith.addf %138, %140 : vector<16x64xf32>
    %142 = arith.addf %27, %141 : vector<16x64xf32>
    %143 = vector.extract_strided_slice %37 {offsets = [4, 0], sizes = [1, 64], strides = [1, 1]} : vector<9x64xf32> to vector<1x64xf32>
    %144 = vector.extract_strided_slice %37 {offsets = [5, 0], sizes = [1, 64], strides = [1, 1]} : vector<9x64xf32> to vector<1x64xf32>
    %cst_47 = arith.constant dense<0.000000e+00> : vector<16xf32>
    %145 = vector.multi_reduction <add>, %142, %cst_47 [1] : vector<16x64xf32> to vector<16xf32>
    %146 = vector.shape_cast %145 : vector<16xf32> to vector<16x1xf32>
    %cst_48 = arith.constant 6.400000e+01 : f32
    %147 = vector.broadcast %cst_48 : f32 to vector<16x1xf32>
    %148 = arith.divf %146, %147 : vector<16x1xf32>
    %149 = vector.broadcast %148 : vector<16x1xf32> to vector<16x64xf32>
    %150 = arith.subf %142, %149 : vector<16x64xf32>
    %151 = vector.broadcast %148 : vector<16x1xf32> to vector<16x64xf32>
    %152 = arith.subf %142, %151 : vector<16x64xf32>
    %153 = arith.mulf %150, %152 : vector<16x64xf32>
    %cst_49 = arith.constant dense<0.000000e+00> : vector<16xf32>
    %154 = vector.multi_reduction <add>, %153, %cst_49 [1] : vector<16x64xf32> to vector<16xf32>
    %155 = vector.shape_cast %154 : vector<16xf32> to vector<16x1xf32>
    %cst_50 = arith.constant 6.400000e+01 : f32
    %156 = vector.broadcast %cst_50 : f32 to vector<16x1xf32>
    %157 = arith.divf %155, %156 : vector<16x1xf32>
    %cst_51 = arith.constant 9.99999996E-13 : f32
    %158 = vector.broadcast %cst_51 : f32 to vector<16x1xf32>
    %159 = arith.addf %157, %158 : vector<16x1xf32>
    %160 = math.rsqrt %159 : vector<16x1xf32>
    %161 = vector.broadcast %148 : vector<16x1xf32> to vector<16x64xf32>
    %162 = arith.subf %142, %161 : vector<16x64xf32>
    %163 = vector.broadcast %160 : vector<16x1xf32> to vector<16x64xf32>
    %164 = arith.mulf %162, %163 : vector<16x64xf32>
    %165 = vector.broadcast %143 : vector<1x64xf32> to vector<16x64xf32>
    %166 = arith.mulf %164, %165 : vector<16x64xf32>
    %167 = vector.broadcast %144 : vector<1x64xf32> to vector<16x64xf32>
    %168 = arith.addf %166, %167 : vector<16x64xf32>
    %169 = arith.truncf %168 : vector<16x64xf32> to vector<16x64xbf16>
    %cst_52 = arith.constant dense<0.000000e+00> : vector<16x128xf32>
    %170 = tpu.matmul %169, %33, %cst_52 {dimension_numbers = #tpu.dot_dimension_numbers<[1], [0], [0], [1], [0, 0, 1, 1], [], []>} : vector<16x64xbf16>, vector<64x128xbf16>, vector<16x128xf32> -> vector<16x128xf32>
    %171 = vector.broadcast %39 : vector<1x128xf32> to vector<16x128xf32>
    %172 = arith.addf %170, %171 : vector<16x128xf32>
    %cst_53 = arith.constant 5.000000e-01 : f32
    %173 = vector.broadcast %cst_53 : f32 to vector<16x128xf32>
    %174 = arith.mulf %173, %172 : vector<16x128xf32>
    %cst_54 = arith.constant 0.707106769 : f32
    %175 = vector.broadcast %cst_54 : f32 to vector<16x128xf32>
    %176 = arith.mulf %172, %175 : vector<16x128xf32>
    %177 = math.absf %176 : vector<16x128xf32>
    %cst_55 = arith.constant 0.327591091 : f32
    %178 = vector.broadcast %cst_55 : f32 to vector<16x128xf32>
    %179 = arith.mulf %178, %177 : vector<16x128xf32>
    %cst_56 = arith.constant 1.000000e+00 : f32
    %180 = vector.broadcast %cst_56 : f32 to vector<16x128xf32>
    %181 = arith.addf %180, %179 : vector<16x128xf32>
    %cst_57 = arith.constant 1.000000e+00 : f32
    %182 = vector.broadcast %cst_57 : f32 to vector<16x128xf32>
    %183 = arith.divf %182, %181 : vector<16x128xf32>
    %cst_58 = arith.constant 1.06140542 : f32
    %184 = vector.broadcast %cst_58 : f32 to vector<16x128xf32>
    %185 = arith.mulf %184, %183 : vector<16x128xf32>
    %cst_59 = arith.constant -1.45315206 : f32
    %186 = vector.broadcast %cst_59 : f32 to vector<16x128xf32>
    %187 = arith.addf %185, %186 : vector<16x128xf32>
    %188 = arith.mulf %187, %183 : vector<16x128xf32>
    %cst_60 = arith.constant 1.42141378 : f32
    %189 = vector.broadcast %cst_60 : f32 to vector<16x128xf32>
    %190 = arith.addf %188, %189 : vector<16x128xf32>
    %191 = arith.mulf %190, %183 : vector<16x128xf32>
    %cst_61 = arith.constant -0.284496725 : f32
    %192 = vector.broadcast %cst_61 : f32 to vector<16x128xf32>
    %193 = arith.addf %191, %192 : vector<16x128xf32>
    %194 = arith.mulf %193, %183 : vector<16x128xf32>
    %cst_62 = arith.constant 0.254829586 : f32
    %195 = vector.broadcast %cst_62 : f32 to vector<16x128xf32>
    %196 = arith.addf %194, %195 : vector<16x128xf32>
    %197 = arith.mulf %196, %183 : vector<16x128xf32>
    %cst_63 = arith.constant 0.000000e+00 : f32
    %198 = vector.broadcast %cst_63 : f32 to vector<16x128xf32>
    %199 = arith.subf %198, %177 : vector<16x128xf32>
    %200 = arith.mulf %199, %177 : vector<16x128xf32>
    %201 = math.exp %200 : vector<16x128xf32>
    %202 = arith.mulf %197, %201 : vector<16x128xf32>
    %cst_64 = arith.constant 1.000000e+00 : f32
    %203 = vector.broadcast %cst_64 : f32 to vector<16x128xf32>
    %204 = arith.subf %203, %202 : vector<16x128xf32>
    %cst_65 = arith.constant 0.000000e+00 : f32
    %205 = vector.broadcast %cst_65 : f32 to vector<16x128xf32>
    %206 = arith.cmpf olt, %176, %205 : vector<16x128xf32>
    %cst_66 = arith.constant 0.000000e+00 : f32
    %207 = vector.broadcast %cst_66 : f32 to vector<16x128xf32>
    %208 = arith.subf %207, %204 : vector<16x128xf32>
    %209 = arith.select %206, %208, %204 : vector<16x128xi1>, vector<16x128xf32>
    %cst_67 = arith.constant 1.000000e+00 : f32
    %210 = vector.broadcast %cst_67 : f32 to vector<16x128xf32>
    %211 = arith.addf %210, %209 : vector<16x128xf32>
    %212 = arith.mulf %174, %211 : vector<16x128xf32>
    %213 = arith.truncf %212 : vector<16x128xf32> to vector<16x128xbf16>
    %cst_68 = arith.constant dense<0.000000e+00> : vector<16x64xf32>
    %214 = tpu.matmul %213, %35, %cst_68 {dimension_numbers = #tpu.dot_dimension_numbers<[1], [0], [0], [1], [0, 0, 1, 1], [], []>} : vector<16x128xbf16>, vector<128x64xbf16>, vector<16x64xf32> -> vector<16x64xf32>
    %215 = vector.extract_strided_slice %37 {offsets = [6, 0], sizes = [1, 64], strides = [1, 1]} : vector<9x64xf32> to vector<1x64xf32>
    %216 = vector.broadcast %215 : vector<1x64xf32> to vector<16x64xf32>
    %217 = arith.addf %214, %216 : vector<16x64xf32>
    %218 = arith.addf %168, %217 : vector<16x64xf32>
    %219 = vector.extract_strided_slice %37 {offsets = [7, 0], sizes = [1, 64], strides = [1, 1]} : vector<9x64xf32> to vector<1x64xf32>
    %220 = vector.extract_strided_slice %37 {offsets = [8, 0], sizes = [1, 64], strides = [1, 1]} : vector<9x64xf32> to vector<1x64xf32>
    %cst_69 = arith.constant dense<0.000000e+00> : vector<16xf32>
    %221 = vector.multi_reduction <add>, %218, %cst_69 [1] : vector<16x64xf32> to vector<16xf32>
    %222 = vector.shape_cast %221 : vector<16xf32> to vector<16x1xf32>
    %cst_70 = arith.constant 6.400000e+01 : f32
    %223 = vector.broadcast %cst_70 : f32 to vector<16x1xf32>
    %224 = arith.divf %222, %223 : vector<16x1xf32>
    %225 = vector.broadcast %224 : vector<16x1xf32> to vector<16x64xf32>
    %226 = arith.subf %218, %225 : vector<16x64xf32>
    %227 = vector.broadcast %224 : vector<16x1xf32> to vector<16x64xf32>
    %228 = arith.subf %218, %227 : vector<16x64xf32>
    %229 = arith.mulf %226, %228 : vector<16x64xf32>
    %cst_71 = arith.constant dense<0.000000e+00> : vector<16xf32>
    %230 = vector.multi_reduction <add>, %229, %cst_71 [1] : vector<16x64xf32> to vector<16xf32>
    %231 = vector.shape_cast %230 : vector<16xf32> to vector<16x1xf32>
    %cst_72 = arith.constant 6.400000e+01 : f32
    %232 = vector.broadcast %cst_72 : f32 to vector<16x1xf32>
    %233 = arith.divf %231, %232 : vector<16x1xf32>
    %cst_73 = arith.constant 9.99999996E-13 : f32
    %234 = vector.broadcast %cst_73 : f32 to vector<16x1xf32>
    %235 = arith.addf %233, %234 : vector<16x1xf32>
    %236 = math.rsqrt %235 : vector<16x1xf32>
    %237 = vector.broadcast %224 : vector<16x1xf32> to vector<16x64xf32>
    %238 = arith.subf %218, %237 : vector<16x64xf32>
    %239 = vector.broadcast %236 : vector<16x1xf32> to vector<16x64xf32>
    %240 = arith.mulf %238, %239 : vector<16x64xf32>
    %241 = vector.broadcast %219 : vector<1x64xf32> to vector<16x64xf32>
    %242 = arith.mulf %240, %241 : vector<16x64xf32>
    %243 = vector.broadcast %220 : vector<1x64xf32> to vector<16x64xf32>
    %244 = arith.addf %242, %243 : vector<16x64xf32>
    %c1 = arith.constant 1 : index
    %c0_74 = arith.constant 0 : index
    %c0_75 = arith.constant 0 : index
    %245 = vector.load %arg2[%c1, %c0_74, %c0_75] : memref<2x64x192xbf16, #tpu.memory_space<vmem>>, vector<1x64x192xbf16>
    %246 = vector.shape_cast %245 : vector<1x64x192xbf16> to vector<64x192xbf16>
    %c1_76 = arith.constant 1 : index
    %c0_77 = arith.constant 0 : index
    %c0_78 = arith.constant 0 : index
    %247 = vector.load %arg3[%c1_76, %c0_77, %c0_78] : memref<2x64x64xbf16, #tpu.memory_space<vmem>>, vector<1x64x64xbf16>
    %248 = vector.shape_cast %247 : vector<1x64x64xbf16> to vector<64x64xbf16>
    %c1_79 = arith.constant 1 : index
    %c0_80 = arith.constant 0 : index
    %c0_81 = arith.constant 0 : index
    %249 = vector.load %arg4[%c1_79, %c0_80, %c0_81] : memref<2x64x128xbf16, #tpu.memory_space<vmem>>, vector<1x64x128xbf16>
    %250 = vector.shape_cast %249 : vector<1x64x128xbf16> to vector<64x128xbf16>
    %c1_82 = arith.constant 1 : index
    %c0_83 = arith.constant 0 : index
    %c0_84 = arith.constant 0 : index
    %251 = vector.load %arg5[%c1_82, %c0_83, %c0_84] : memref<2x128x64xbf16, #tpu.memory_space<vmem>>, vector<1x128x64xbf16>
    %252 = vector.shape_cast %251 : vector<1x128x64xbf16> to vector<128x64xbf16>
    %c1_85 = arith.constant 1 : index
    %c0_86 = arith.constant 0 : index
    %c0_87 = arith.constant 0 : index
    %253 = vector.load %arg6[%c1_85, %c0_86, %c0_87] : memref<2x9x64xf32, #tpu.memory_space<vmem>>, vector<1x9x64xf32>
    %254 = vector.shape_cast %253 : vector<1x9x64xf32> to vector<9x64xf32>
    %c1_88 = arith.constant 1 : index
    %c0_89 = arith.constant 0 : index
    %c0_90 = arith.constant 0 : index
    %255 = vector.load %arg7[%c1_88, %c0_89, %c0_90] : memref<2x1x128xf32, #tpu.memory_space<vmem>>, vector<1x1x128xf32>
    %256 = vector.shape_cast %255 : vector<1x1x128xf32> to vector<1x128xf32>
    %257 = arith.truncf %244 : vector<16x64xf32> to vector<16x64xbf16>
    %cst_91 = arith.constant dense<0.000000e+00> : vector<16x192xf32>
    %258 = tpu.matmul %257, %246, %cst_91 {dimension_numbers = #tpu.dot_dimension_numbers<[1], [0], [0], [1], [0, 0, 1, 1], [], []>} : vector<16x64xbf16>, vector<64x192xbf16>, vector<16x192xf32> -> vector<16x192xf32>
    %259 = vector.extract_strided_slice %258 {offsets = [0, 0], sizes = [16, 64], strides = [1, 1]} : vector<16x192xf32> to vector<16x64xf32>
    %260 = vector.extract_strided_slice %254 {offsets = [0, 0], sizes = [1, 64], strides = [1, 1]} : vector<9x64xf32> to vector<1x64xf32>
    %261 = vector.broadcast %260 : vector<1x64xf32> to vector<16x64xf32>
    %262 = arith.addf %259, %261 : vector<16x64xf32>
    %263 = arith.truncf %262 : vector<16x64xf32> to vector<16x64xbf16>
    %264 = vector.shape_cast %263 : vector<16x64xbf16> to vector<2x8x64xbf16>
    %265 = vector.extract_strided_slice %258 {offsets = [0, 64], sizes = [16, 64], strides = [1, 1]} : vector<16x192xf32> to vector<16x64xf32>
    %266 = vector.extract_strided_slice %254 {offsets = [1, 0], sizes = [1, 64], strides = [1, 1]} : vector<9x64xf32> to vector<1x64xf32>
    %267 = vector.broadcast %266 : vector<1x64xf32> to vector<16x64xf32>
    %268 = arith.addf %265, %267 : vector<16x64xf32>
    %269 = arith.truncf %268 : vector<16x64xf32> to vector<16x64xbf16>
    %270 = vector.shape_cast %269 : vector<16x64xbf16> to vector<2x8x64xbf16>
    %271 = vector.extract_strided_slice %258 {offsets = [0, 128], sizes = [16, 64], strides = [1, 1]} : vector<16x192xf32> to vector<16x64xf32>
    %272 = vector.extract_strided_slice %254 {offsets = [2, 0], sizes = [1, 64], strides = [1, 1]} : vector<9x64xf32> to vector<1x64xf32>
    %273 = vector.broadcast %272 : vector<1x64xf32> to vector<16x64xf32>
    %274 = arith.addf %271, %273 : vector<16x64xf32>
    %275 = arith.truncf %274 : vector<16x64xf32> to vector<16x64xbf16>
    %276 = vector.shape_cast %275 : vector<16x64xbf16> to vector<2x8x64xbf16>
    %277 = vector.extract_strided_slice %264 {offsets = [0, 0, 0], sizes = [2, 8, 16], strides = [1, 1, 1]} : vector<2x8x64xbf16> to vector<2x8x16xbf16>
    %278 = vector.extract_strided_slice %270 {offsets = [0, 0, 0], sizes = [2, 8, 16], strides = [1, 1, 1]} : vector<2x8x64xbf16> to vector<2x8x16xbf16>
    %279 = vector.extract_strided_slice %276 {offsets = [0, 0, 0], sizes = [2, 8, 16], strides = [1, 1, 1]} : vector<2x8x64xbf16> to vector<2x8x16xbf16>
    "tpu.trace_start"() <{level = 10 : i32, message = "bqd,bkd->bqk"}> : () -> ()
    %cst_92 = arith.constant dense<0.000000e+00> : vector<2x8x8xf32>
    %280 = tpu.matmul %277, %278, %cst_92 {dimension_numbers = #tpu.dot_dimension_numbers<[2], [2], [1], [1], [0, 0, 0, 1, 1, 1], [0], [0]>} : vector<2x8x16xbf16>, vector<2x8x16xbf16>, vector<2x8x8xf32> -> vector<2x8x8xf32>
    "tpu.trace_stop"() : () -> ()
    %cst_93 = arith.constant 2.500000e-01 : f32
    %281 = vector.broadcast %cst_93 : f32 to vector<2x8x8xf32>
    %282 = arith.mulf %280, %281 : vector<2x8x8xf32>
    %cst_94 = arith.constant dense<0xFF800000> : vector<2x8xf32>
    %283 = vector.multi_reduction <maximumf>, %282, %cst_94 [2] : vector<2x8x8xf32> to vector<2x8xf32>
    %284 = vector.shape_cast %283 : vector<2x8xf32> to vector<2x8x1xf32>
    %285 = vector.broadcast %284 : vector<2x8x1xf32> to vector<2x8x8xf32>
    %286 = arith.subf %282, %285 : vector<2x8x8xf32>
    %287 = math.exp %286 : vector<2x8x8xf32>
    %cst_95 = arith.constant dense<0.000000e+00> : vector<2x8xf32>
    %288 = vector.multi_reduction <add>, %287, %cst_95 [2] : vector<2x8x8xf32> to vector<2x8xf32>
    %289 = vector.shape_cast %288 : vector<2x8xf32> to vector<2x8x1xf32>
    %290 = tpu.reciprocal %289 {approx = true} : vector<2x8x1xf32> -> vector<2x8x1xf32>
    %291 = vector.broadcast %290 : vector<2x8x1xf32> to vector<2x8x8xf32>
    %292 = arith.mulf %287, %291 : vector<2x8x8xf32>
    %293 = arith.truncf %292 : vector<2x8x8xf32> to vector<2x8x8xbf16>
    "tpu.trace_start"() <{level = 10 : i32, message = "bqk,bkd->bqd"}> : () -> ()
    %cst_96 = arith.constant dense<0.000000e+00> : vector<2x8x16xf32>
    %294 = tpu.matmul %293, %279, %cst_96 {dimension_numbers = #tpu.dot_dimension_numbers<[2], [1], [1], [2], [0, 0, 0, 1, 1, 2], [0], [0]>} : vector<2x8x8xbf16>, vector<2x8x16xbf16>, vector<2x8x16xf32> -> vector<2x8x16xf32>
    "tpu.trace_stop"() : () -> ()
    %295 = vector.shape_cast %294 : vector<2x8x16xf32> to vector<16x16xf32>
    %296 = vector.extract_strided_slice %264 {offsets = [0, 0, 16], sizes = [2, 8, 16], strides = [1, 1, 1]} : vector<2x8x64xbf16> to vector<2x8x16xbf16>
    %297 = vector.extract_strided_slice %270 {offsets = [0, 0, 16], sizes = [2, 8, 16], strides = [1, 1, 1]} : vector<2x8x64xbf16> to vector<2x8x16xbf16>
    %298 = vector.extract_strided_slice %276 {offsets = [0, 0, 16], sizes = [2, 8, 16], strides = [1, 1, 1]} : vector<2x8x64xbf16> to vector<2x8x16xbf16>
    "tpu.trace_start"() <{level = 10 : i32, message = "bqd,bkd->bqk"}> : () -> ()
    %cst_97 = arith.constant dense<0.000000e+00> : vector<2x8x8xf32>
    %299 = tpu.matmul %296, %297, %cst_97 {dimension_numbers = #tpu.dot_dimension_numbers<[2], [2], [1], [1], [0, 0, 0, 1, 1, 1], [0], [0]>} : vector<2x8x16xbf16>, vector<2x8x16xbf16>, vector<2x8x8xf32> -> vector<2x8x8xf32>
    "tpu.trace_stop"() : () -> ()
    %cst_98 = arith.constant 2.500000e-01 : f32
    %300 = vector.broadcast %cst_98 : f32 to vector<2x8x8xf32>
    %301 = arith.mulf %299, %300 : vector<2x8x8xf32>
    %cst_99 = arith.constant dense<0xFF800000> : vector<2x8xf32>
    %302 = vector.multi_reduction <maximumf>, %301, %cst_99 [2] : vector<2x8x8xf32> to vector<2x8xf32>
    %303 = vector.shape_cast %302 : vector<2x8xf32> to vector<2x8x1xf32>
    %304 = vector.broadcast %303 : vector<2x8x1xf32> to vector<2x8x8xf32>
    %305 = arith.subf %301, %304 : vector<2x8x8xf32>
    %306 = math.exp %305 : vector<2x8x8xf32>
    %cst_100 = arith.constant dense<0.000000e+00> : vector<2x8xf32>
    %307 = vector.multi_reduction <add>, %306, %cst_100 [2] : vector<2x8x8xf32> to vector<2x8xf32>
    %308 = vector.shape_cast %307 : vector<2x8xf32> to vector<2x8x1xf32>
    %309 = tpu.reciprocal %308 {approx = true} : vector<2x8x1xf32> -> vector<2x8x1xf32>
    %310 = vector.broadcast %309 : vector<2x8x1xf32> to vector<2x8x8xf32>
    %311 = arith.mulf %306, %310 : vector<2x8x8xf32>
    %312 = arith.truncf %311 : vector<2x8x8xf32> to vector<2x8x8xbf16>
    "tpu.trace_start"() <{level = 10 : i32, message = "bqk,bkd->bqd"}> : () -> ()
    %cst_101 = arith.constant dense<0.000000e+00> : vector<2x8x16xf32>
    %313 = tpu.matmul %312, %298, %cst_101 {dimension_numbers = #tpu.dot_dimension_numbers<[2], [1], [1], [2], [0, 0, 0, 1, 1, 2], [0], [0]>} : vector<2x8x8xbf16>, vector<2x8x16xbf16>, vector<2x8x16xf32> -> vector<2x8x16xf32>
    "tpu.trace_stop"() : () -> ()
    %314 = vector.shape_cast %313 : vector<2x8x16xf32> to vector<16x16xf32>
    %315 = vector.extract_strided_slice %264 {offsets = [0, 0, 32], sizes = [2, 8, 16], strides = [1, 1, 1]} : vector<2x8x64xbf16> to vector<2x8x16xbf16>
    %316 = vector.extract_strided_slice %270 {offsets = [0, 0, 32], sizes = [2, 8, 16], strides = [1, 1, 1]} : vector<2x8x64xbf16> to vector<2x8x16xbf16>
    %317 = vector.extract_strided_slice %276 {offsets = [0, 0, 32], sizes = [2, 8, 16], strides = [1, 1, 1]} : vector<2x8x64xbf16> to vector<2x8x16xbf16>
    "tpu.trace_start"() <{level = 10 : i32, message = "bqd,bkd->bqk"}> : () -> ()
    %cst_102 = arith.constant dense<0.000000e+00> : vector<2x8x8xf32>
    %318 = tpu.matmul %315, %316, %cst_102 {dimension_numbers = #tpu.dot_dimension_numbers<[2], [2], [1], [1], [0, 0, 0, 1, 1, 1], [0], [0]>} : vector<2x8x16xbf16>, vector<2x8x16xbf16>, vector<2x8x8xf32> -> vector<2x8x8xf32>
    "tpu.trace_stop"() : () -> ()
    %cst_103 = arith.constant 2.500000e-01 : f32
    %319 = vector.broadcast %cst_103 : f32 to vector<2x8x8xf32>
    %320 = arith.mulf %318, %319 : vector<2x8x8xf32>
    %cst_104 = arith.constant dense<0xFF800000> : vector<2x8xf32>
    %321 = vector.multi_reduction <maximumf>, %320, %cst_104 [2] : vector<2x8x8xf32> to vector<2x8xf32>
    %322 = vector.shape_cast %321 : vector<2x8xf32> to vector<2x8x1xf32>
    %323 = vector.broadcast %322 : vector<2x8x1xf32> to vector<2x8x8xf32>
    %324 = arith.subf %320, %323 : vector<2x8x8xf32>
    %325 = math.exp %324 : vector<2x8x8xf32>
    %cst_105 = arith.constant dense<0.000000e+00> : vector<2x8xf32>
    %326 = vector.multi_reduction <add>, %325, %cst_105 [2] : vector<2x8x8xf32> to vector<2x8xf32>
    %327 = vector.shape_cast %326 : vector<2x8xf32> to vector<2x8x1xf32>
    %328 = tpu.reciprocal %327 {approx = true} : vector<2x8x1xf32> -> vector<2x8x1xf32>
    %329 = vector.broadcast %328 : vector<2x8x1xf32> to vector<2x8x8xf32>
    %330 = arith.mulf %325, %329 : vector<2x8x8xf32>
    %331 = arith.truncf %330 : vector<2x8x8xf32> to vector<2x8x8xbf16>
    "tpu.trace_start"() <{level = 10 : i32, message = "bqk,bkd->bqd"}> : () -> ()
    %cst_106 = arith.constant dense<0.000000e+00> : vector<2x8x16xf32>
    %332 = tpu.matmul %331, %317, %cst_106 {dimension_numbers = #tpu.dot_dimension_numbers<[2], [1], [1], [2], [0, 0, 0, 1, 1, 2], [0], [0]>} : vector<2x8x8xbf16>, vector<2x8x16xbf16>, vector<2x8x16xf32> -> vector<2x8x16xf32>
    "tpu.trace_stop"() : () -> ()
    %333 = vector.shape_cast %332 : vector<2x8x16xf32> to vector<16x16xf32>
    %334 = vector.extract_strided_slice %264 {offsets = [0, 0, 48], sizes = [2, 8, 16], strides = [1, 1, 1]} : vector<2x8x64xbf16> to vector<2x8x16xbf16>
    %335 = vector.extract_strided_slice %270 {offsets = [0, 0, 48], sizes = [2, 8, 16], strides = [1, 1, 1]} : vector<2x8x64xbf16> to vector<2x8x16xbf16>
    %336 = vector.extract_strided_slice %276 {offsets = [0, 0, 48], sizes = [2, 8, 16], strides = [1, 1, 1]} : vector<2x8x64xbf16> to vector<2x8x16xbf16>
    "tpu.trace_start"() <{level = 10 : i32, message = "bqd,bkd->bqk"}> : () -> ()
    %cst_107 = arith.constant dense<0.000000e+00> : vector<2x8x8xf32>
    %337 = tpu.matmul %334, %335, %cst_107 {dimension_numbers = #tpu.dot_dimension_numbers<[2], [2], [1], [1], [0, 0, 0, 1, 1, 1], [0], [0]>} : vector<2x8x16xbf16>, vector<2x8x16xbf16>, vector<2x8x8xf32> -> vector<2x8x8xf32>
    "tpu.trace_stop"() : () -> ()
    %cst_108 = arith.constant 2.500000e-01 : f32
    %338 = vector.broadcast %cst_108 : f32 to vector<2x8x8xf32>
    %339 = arith.mulf %337, %338 : vector<2x8x8xf32>
    %cst_109 = arith.constant dense<0xFF800000> : vector<2x8xf32>
    %340 = vector.multi_reduction <maximumf>, %339, %cst_109 [2] : vector<2x8x8xf32> to vector<2x8xf32>
    %341 = vector.shape_cast %340 : vector<2x8xf32> to vector<2x8x1xf32>
    %342 = vector.broadcast %341 : vector<2x8x1xf32> to vector<2x8x8xf32>
    %343 = arith.subf %339, %342 : vector<2x8x8xf32>
    %344 = math.exp %343 : vector<2x8x8xf32>
    %cst_110 = arith.constant dense<0.000000e+00> : vector<2x8xf32>
    %345 = vector.multi_reduction <add>, %344, %cst_110 [2] : vector<2x8x8xf32> to vector<2x8xf32>
    %346 = vector.shape_cast %345 : vector<2x8xf32> to vector<2x8x1xf32>
    %347 = tpu.reciprocal %346 {approx = true} : vector<2x8x1xf32> -> vector<2x8x1xf32>
    %348 = vector.broadcast %347 : vector<2x8x1xf32> to vector<2x8x8xf32>
    %349 = arith.mulf %344, %348 : vector<2x8x8xf32>
    %350 = arith.truncf %349 : vector<2x8x8xf32> to vector<2x8x8xbf16>
    "tpu.trace_start"() <{level = 10 : i32, message = "bqk,bkd->bqd"}> : () -> ()
    %cst_111 = arith.constant dense<0.000000e+00> : vector<2x8x16xf32>
    %351 = tpu.matmul %350, %336, %cst_111 {dimension_numbers = #tpu.dot_dimension_numbers<[2], [1], [1], [2], [0, 0, 0, 1, 1, 2], [0], [0]>} : vector<2x8x8xbf16>, vector<2x8x16xbf16>, vector<2x8x16xf32> -> vector<2x8x16xf32>
    "tpu.trace_stop"() : () -> ()
    %352 = vector.shape_cast %351 : vector<2x8x16xf32> to vector<16x16xf32>
    %353 = tpu.concatenate %295, %314, %333, %352 in 1 : vector<16x16xf32>, vector<16x16xf32>, vector<16x16xf32>, vector<16x16xf32> -> vector<16x64xf32>
    %354 = arith.truncf %353 : vector<16x64xf32> to vector<16x64xbf16>
    %cst_112 = arith.constant dense<0.000000e+00> : vector<16x64xf32>
    %355 = tpu.matmul %354, %248, %cst_112 {dimension_numbers = #tpu.dot_dimension_numbers<[1], [0], [0], [1], [0, 0, 1, 1], [], []>} : vector<16x64xbf16>, vector<64x64xbf16>, vector<16x64xf32> -> vector<16x64xf32>
    %356 = vector.extract_strided_slice %254 {offsets = [3, 0], sizes = [1, 64], strides = [1, 1]} : vector<9x64xf32> to vector<1x64xf32>
    %357 = vector.broadcast %356 : vector<1x64xf32> to vector<16x64xf32>
    %358 = arith.addf %355, %357 : vector<16x64xf32>
    %359 = arith.addf %244, %358 : vector<16x64xf32>
    %360 = vector.extract_strided_slice %254 {offsets = [4, 0], sizes = [1, 64], strides = [1, 1]} : vector<9x64xf32> to vector<1x64xf32>
    %361 = vector.extract_strided_slice %254 {offsets = [5, 0], sizes = [1, 64], strides = [1, 1]} : vector<9x64xf32> to vector<1x64xf32>
    %cst_113 = arith.constant dense<0.000000e+00> : vector<16xf32>
    %362 = vector.multi_reduction <add>, %359, %cst_113 [1] : vector<16x64xf32> to vector<16xf32>
    %363 = vector.shape_cast %362 : vector<16xf32> to vector<16x1xf32>
    %cst_114 = arith.constant 6.400000e+01 : f32
    %364 = vector.broadcast %cst_114 : f32 to vector<16x1xf32>
    %365 = arith.divf %363, %364 : vector<16x1xf32>
    %366 = vector.broadcast %365 : vector<16x1xf32> to vector<16x64xf32>
    %367 = arith.subf %359, %366 : vector<16x64xf32>
    %368 = vector.broadcast %365 : vector<16x1xf32> to vector<16x64xf32>
    %369 = arith.subf %359, %368 : vector<16x64xf32>
    %370 = arith.mulf %367, %369 : vector<16x64xf32>
    %cst_115 = arith.constant dense<0.000000e+00> : vector<16xf32>
    %371 = vector.multi_reduction <add>, %370, %cst_115 [1] : vector<16x64xf32> to vector<16xf32>
    %372 = vector.shape_cast %371 : vector<16xf32> to vector<16x1xf32>
    %cst_116 = arith.constant 6.400000e+01 : f32
    %373 = vector.broadcast %cst_116 : f32 to vector<16x1xf32>
    %374 = arith.divf %372, %373 : vector<16x1xf32>
    %cst_117 = arith.constant 9.99999996E-13 : f32
    %375 = vector.broadcast %cst_117 : f32 to vector<16x1xf32>
    %376 = arith.addf %374, %375 : vector<16x1xf32>
    %377 = math.rsqrt %376 : vector<16x1xf32>
    %378 = vector.broadcast %365 : vector<16x1xf32> to vector<16x64xf32>
    %379 = arith.subf %359, %378 : vector<16x64xf32>
    %380 = vector.broadcast %377 : vector<16x1xf32> to vector<16x64xf32>
    %381 = arith.mulf %379, %380 : vector<16x64xf32>
    %382 = vector.broadcast %360 : vector<1x64xf32> to vector<16x64xf32>
    %383 = arith.mulf %381, %382 : vector<16x64xf32>
    %384 = vector.broadcast %361 : vector<1x64xf32> to vector<16x64xf32>
    %385 = arith.addf %383, %384 : vector<16x64xf32>
    %386 = arith.truncf %385 : vector<16x64xf32> to vector<16x64xbf16>
    %cst_118 = arith.constant dense<0.000000e+00> : vector<16x128xf32>
    %387 = tpu.matmul %386, %250, %cst_118 {dimension_numbers = #tpu.dot_dimension_numbers<[1], [0], [0], [1], [0, 0, 1, 1], [], []>} : vector<16x64xbf16>, vector<64x128xbf16>, vector<16x128xf32> -> vector<16x128xf32>
    %388 = vector.broadcast %256 : vector<1x128xf32> to vector<16x128xf32>
    %389 = arith.addf %387, %388 : vector<16x128xf32>
    %cst_119 = arith.constant 5.000000e-01 : f32
    %390 = vector.broadcast %cst_119 : f32 to vector<16x128xf32>
    %391 = arith.mulf %390, %389 : vector<16x128xf32>
    %cst_120 = arith.constant 0.707106769 : f32
    %392 = vector.broadcast %cst_120 : f32 to vector<16x128xf32>
    %393 = arith.mulf %389, %392 : vector<16x128xf32>
    %394 = math.absf %393 : vector<16x128xf32>
    %cst_121 = arith.constant 0.327591091 : f32
    %395 = vector.broadcast %cst_121 : f32 to vector<16x128xf32>
    %396 = arith.mulf %395, %394 : vector<16x128xf32>
    %cst_122 = arith.constant 1.000000e+00 : f32
    %397 = vector.broadcast %cst_122 : f32 to vector<16x128xf32>
    %398 = arith.addf %397, %396 : vector<16x128xf32>
    %cst_123 = arith.constant 1.000000e+00 : f32
    %399 = vector.broadcast %cst_123 : f32 to vector<16x128xf32>
    %400 = arith.divf %399, %398 : vector<16x128xf32>
    %cst_124 = arith.constant 1.06140542 : f32
    %401 = vector.broadcast %cst_124 : f32 to vector<16x128xf32>
    %402 = arith.mulf %401, %400 : vector<16x128xf32>
    %cst_125 = arith.constant -1.45315206 : f32
    %403 = vector.broadcast %cst_125 : f32 to vector<16x128xf32>
    %404 = arith.addf %402, %403 : vector<16x128xf32>
    %405 = arith.mulf %404, %400 : vector<16x128xf32>
    %cst_126 = arith.constant 1.42141378 : f32
    %406 = vector.broadcast %cst_126 : f32 to vector<16x128xf32>
    %407 = arith.addf %405, %406 : vector<16x128xf32>
    %408 = arith.mulf %407, %400 : vector<16x128xf32>
    %cst_127 = arith.constant -0.284496725 : f32
    %409 = vector.broadcast %cst_127 : f32 to vector<16x128xf32>
    %410 = arith.addf %408, %409 : vector<16x128xf32>
    %411 = arith.mulf %410, %400 : vector<16x128xf32>
    %cst_128 = arith.constant 0.254829586 : f32
    %412 = vector.broadcast %cst_128 : f32 to vector<16x128xf32>
    %413 = arith.addf %411, %412 : vector<16x128xf32>
    %414 = arith.mulf %413, %400 : vector<16x128xf32>
    %cst_129 = arith.constant 0.000000e+00 : f32
    %415 = vector.broadcast %cst_129 : f32 to vector<16x128xf32>
    %416 = arith.subf %415, %394 : vector<16x128xf32>
    %417 = arith.mulf %416, %394 : vector<16x128xf32>
    %418 = math.exp %417 : vector<16x128xf32>
    %419 = arith.mulf %414, %418 : vector<16x128xf32>
    %cst_130 = arith.constant 1.000000e+00 : f32
    %420 = vector.broadcast %cst_130 : f32 to vector<16x128xf32>
    %421 = arith.subf %420, %419 : vector<16x128xf32>
    %cst_131 = arith.constant 0.000000e+00 : f32
    %422 = vector.broadcast %cst_131 : f32 to vector<16x128xf32>
    %423 = arith.cmpf olt, %393, %422 : vector<16x128xf32>
    %cst_132 = arith.constant 0.000000e+00 : f32
    %424 = vector.broadcast %cst_132 : f32 to vector<16x128xf32>
    %425 = arith.subf %424, %421 : vector<16x128xf32>
    %426 = arith.select %423, %425, %421 : vector<16x128xi1>, vector<16x128xf32>
    %cst_133 = arith.constant 1.000000e+00 : f32
    %427 = vector.broadcast %cst_133 : f32 to vector<16x128xf32>
    %428 = arith.addf %427, %426 : vector<16x128xf32>
    %429 = arith.mulf %391, %428 : vector<16x128xf32>
    %430 = arith.truncf %429 : vector<16x128xf32> to vector<16x128xbf16>
    %cst_134 = arith.constant dense<0.000000e+00> : vector<16x64xf32>
    %431 = tpu.matmul %430, %252, %cst_134 {dimension_numbers = #tpu.dot_dimension_numbers<[1], [0], [0], [1], [0, 0, 1, 1], [], []>} : vector<16x128xbf16>, vector<128x64xbf16>, vector<16x64xf32> -> vector<16x64xf32>
    %432 = vector.extract_strided_slice %254 {offsets = [6, 0], sizes = [1, 64], strides = [1, 1]} : vector<9x64xf32> to vector<1x64xf32>
    %433 = vector.broadcast %432 : vector<1x64xf32> to vector<16x64xf32>
    %434 = arith.addf %431, %433 : vector<16x64xf32>
    %435 = arith.addf %385, %434 : vector<16x64xf32>
    %436 = vector.extract_strided_slice %254 {offsets = [7, 0], sizes = [1, 64], strides = [1, 1]} : vector<9x64xf32> to vector<1x64xf32>
    %437 = vector.extract_strided_slice %254 {offsets = [8, 0], sizes = [1, 64], strides = [1, 1]} : vector<9x64xf32> to vector<1x64xf32>
    %cst_135 = arith.constant dense<0.000000e+00> : vector<16xf32>
    %438 = vector.multi_reduction <add>, %435, %cst_135 [1] : vector<16x64xf32> to vector<16xf32>
    %439 = vector.shape_cast %438 : vector<16xf32> to vector<16x1xf32>
    %cst_136 = arith.constant 6.400000e+01 : f32
    %440 = vector.broadcast %cst_136 : f32 to vector<16x1xf32>
    %441 = arith.divf %439, %440 : vector<16x1xf32>
    %442 = vector.broadcast %441 : vector<16x1xf32> to vector<16x64xf32>
    %443 = arith.subf %435, %442 : vector<16x64xf32>
    %444 = vector.broadcast %441 : vector<16x1xf32> to vector<16x64xf32>
    %445 = arith.subf %435, %444 : vector<16x64xf32>
    %446 = arith.mulf %443, %445 : vector<16x64xf32>
    %cst_137 = arith.constant dense<0.000000e+00> : vector<16xf32>
    %447 = vector.multi_reduction <add>, %446, %cst_137 [1] : vector<16x64xf32> to vector<16xf32>
    %448 = vector.shape_cast %447 : vector<16xf32> to vector<16x1xf32>
    %cst_138 = arith.constant 6.400000e+01 : f32
    %449 = vector.broadcast %cst_138 : f32 to vector<16x1xf32>
    %450 = arith.divf %448, %449 : vector<16x1xf32>
    %cst_139 = arith.constant 9.99999996E-13 : f32
    %451 = vector.broadcast %cst_139 : f32 to vector<16x1xf32>
    %452 = arith.addf %450, %451 : vector<16x1xf32>
    %453 = math.rsqrt %452 : vector<16x1xf32>
    %454 = vector.broadcast %441 : vector<16x1xf32> to vector<16x64xf32>
    %455 = arith.subf %435, %454 : vector<16x64xf32>
    %456 = vector.broadcast %453 : vector<16x1xf32> to vector<16x64xf32>
    %457 = arith.mulf %455, %456 : vector<16x64xf32>
    %458 = vector.broadcast %436 : vector<1x64xf32> to vector<16x64xf32>
    %459 = arith.mulf %457, %458 : vector<16x64xf32>
    %460 = vector.broadcast %437 : vector<1x64xf32> to vector<16x64xf32>
    %461 = arith.addf %459, %460 : vector<16x64xf32>
    %462 = arith.truncf %461 : vector<16x64xf32> to vector<16x64xbf16>
    %c0_140 = arith.constant 0 : index
    %c0_141 = arith.constant 0 : index
    %463 = vector.load %arg8[%c0_140, %c0_141] : memref<64x64xbf16, #tpu.memory_space<vmem>>, vector<64x64xbf16>
    %cst_142 = arith.constant dense<0.000000e+00> : vector<16x64xf32>
    %464 = tpu.matmul %462, %463, %cst_142 {dimension_numbers = #tpu.dot_dimension_numbers<[1], [0], [0], [1], [0, 0, 1, 1], [], []>} : vector<16x64xbf16>, vector<64x64xbf16>, vector<16x64xf32> -> vector<16x64xf32>
    %c0_143 = arith.constant 0 : index
    %c0_144 = arith.constant 0 : index
    %465 = vector.load %arg9[%c0_143, %c0_144] : memref<1x64xf32, #tpu.memory_space<vmem>>, vector<1x64xf32>
    %466 = vector.broadcast %465 : vector<1x64xf32> to vector<16x64xf32>
    %467 = arith.addf %464, %466 : vector<16x64xf32>
    %cst_145 = arith.constant 0.000000e+00 : f32
    %468 = vector.broadcast %cst_145 : f32 to vector<16x64xf32>
    %469 = arith.maximumf %467, %468 : vector<16x64xf32>
    %470 = arith.truncf %469 : vector<16x64xf32> to vector<16x64xbf16>
    %c0_146 = arith.constant 0 : index
    %c0_147 = arith.constant 0 : index
    %471 = vector.load %arg10[%c0_146, %c0_147] : memref<64x128xbf16, #tpu.memory_space<vmem>>, vector<64x128xbf16>
    %cst_148 = arith.constant dense<0.000000e+00> : vector<16x128xf32>
    %472 = tpu.matmul %470, %471, %cst_148 {dimension_numbers = #tpu.dot_dimension_numbers<[1], [0], [0], [1], [0, 0, 1, 1], [], []>} : vector<16x64xbf16>, vector<64x128xbf16>, vector<16x128xf32> -> vector<16x128xf32>
    %c0_149 = arith.constant 0 : index
    %c0_150 = arith.constant 0 : index
    %473 = vector.load %arg11[%c0_149, %c0_150] : memref<1x128xf32, #tpu.memory_space<vmem>>, vector<1x128xf32>
    %474 = vector.broadcast %473 : vector<1x128xf32> to vector<16x128xf32>
    %475 = arith.addf %472, %474 : vector<16x128xf32>
    %c0_151 = arith.constant 0 : index
    %c0_152 = arith.constant 0 : index
    %476 = vector.load %arg12[%c0_151, %c0_152] : memref<16x128xf32, #tpu.memory_space<vmem>>, vector<16x128xf32>
    tpu.vector_store %arg12[%c0_151, %c0_152], %475 {strides = array<i32>} : memref<16x128xf32, #tpu.memory_space<vmem>>, vector<16x128xf32>,
    return
  }
}

</mosaic_0001>

<bundles_post_ra>
// kernel: distilbert_forward.1
= control target key start
LH: loop header
LB: loop body
LE: loop exit
PB: predicated region body
PF: predicated region fallthrough
CT: control target
= control target key end

     0   :  { %vm45_vm0 = vcmask 523264   ;;  %v3975_v15 = vmov 0   ;;  %v73_v23 = vlaneseq  ;;  %s3976_s24 = smov 64   ;;  %v3977_v47 = vmov 0.0   ;;  %s3980_s26 = smov 112   ;;  %s4795_s0 = inlined_call_operand.vmem [shape: f32[16,64], index: 0, kind: input, shape index: {}]   ;;  %s4796_s2 = inlined_call_operand.vmem [shape: bf16[2,64,192], index: 2, kind: input, shape index: {}]   ;;  %s4797_s6 = inlined_call_operand.vmem [shape: f32[2,9,64], index: 6, kind: input, shape index: {}]   ;;  %s4798_s1 = inlined_call_operand.vmem [shape: f32[2,64], index: 1, kind: input, shape index: {}]   ;;  %s4799_s3 = inlined_call_operand.vmem [shape: bf16[2,64,64], index: 3, kind: input, shape index: {}]   ;;  %s4800_s4 = inlined_call_operand.vmem [shape: bf16[2,64,128], index: 4, kind: input, shape index: {}]   ;;  %s4801_s5 = inlined_call_operand.vmem [shape: bf16[2,128,64], index: 5, kind: input, shape index: {}]   ;;  %s4802_s7 = inlined_call_operand.vmem [shape: f32[2,1,128], index: 7, kind: input, shape index: {}]   ;;  %s4803_s8 = inlined_call_operand.vmem [shape: bf16[64,64], index: 8, kind: input, shape index: {}]   ;;  %s4804_s10 = inlined_call_operand.vmem [shape: bf16[64,128], index: 10, kind: input, shape index: {}]   ;;  %s4805_s9 = inlined_call_operand.vmem [shape: f32[1,64], index: 9, kind: input, shape index: {}]   ;;  %s4806_s11 = inlined_call_operand.vmem [shape: f32[1,128], index: 11, kind: input, shape index: {}]   ;;  %s4807_s12 = inlined_call_operand.vmem [shape: f32[16,128], index: 12, kind: output, shape index: {}]  }
   0x1   :  { %v43_v0 = vld [vmem:[%s4795_s0] sm:$0xff]  ;;  %v44_v1 = vld [vmem:[%s4795_s0 + $0x8] sm:$0xff]  ;;  %v3809_v14 = vld [vmem:[%s4796_s2 + $0x34] ss:$8 sps:$4 sm:$0xff]   ;;  %204 = vmatprep.mubr.bf16.mxu0 %v3975_v15  ;;  %3465 = vmatprep.subr.bf16.mxu1 %v3977_v47  ;;  %vm3978_vm1 = vmmov 0   ;;  %vm382_vm2 = vcmask 1043456  }
   0x2   :  { %v46_v2 = vsel %vm45_vm0, %v43_v0, 0.0  ;;  %v49_v3 = vsel %vm45_vm0, %v44_v1, 0.0  ;;  %v3811_v16 = vld [vmem:[%s4796_s2 + $0x30] ss:$8 sps:$4 sm:$0xff]   ;;  %180 = vmatprep.subr.bf16.mxu0 %v3809_v14  ;;  %v3812_v17 = vld [vmem:[%s4796_s2 + $0x24] ss:$8 sps:$4 sm:$0xff]   ;;  %3467 = vmatprep.mubr.msk.bf16.mxu1 %vm3978_vm1, %v3977_v47 }
   0x3   :  { %47 = vadd.xlane.f32.xlu0 %v46_v2  ;;  %181 = vmatpush1.bf16.msra.mxu0 %v3811_v16  ;;  %v3814_v18 = vld [vmem:[%s4796_s2 + $0x20] ss:$8 sps:$4 sm:$0xff]   ;;  %v3815_v19 = vld [vmem:[%s4796_s2 + $0x14] ss:$8 sps:$4 sm:$0xff]   ;;  %v3817_v20 = vld [vmem:[%s4796_s2 + $0x10] ss:$8 sps:$4 sm:$0xff]  }
   0x4   :  { %182 = vmatprep.subr.bf16.mxu0 %v3812_v17  ;;  %v3818_v21 = vld [vmem:[%s4796_s2 + $0x4] ss:$8 sps:$4 sm:$0xff]   ;;  %v3820_v22 = vld [vmem:[%s4796_s2] ss:$8 sps:$4 sm:$0xff]   ;;  %v4085_v24 = vshrl.u32 %v73_v23, 7  ;;  %vm256_vm3 = vcmask 130048  }
   0x5   :  { %v4093_v26 = vld [vmem:[%s4797_s6] sm:$0xff]  ;;  %vm354_vm4 = vcmask 64512   ;;  %s3981_s27 = smov 32   ;;  %s3982_s28 = smov 96   ;;  %vm1164_vm5 = vcmask 261120   ;;  %vm1167_vm6 = vcmask 392192  }
   0x6   :  { %v4088_v25 = vsub.s32 1, %v4085_v24  ;;  %v4099_v34 = vsub.s32 0, %v4085_v24  ;;  %v42_v35 = vld [vmem:[%s4798_s1] sm:$0x3]  ;;  %v243_v48 = vsub.s32 2, %v4085_v24  ;;  %s3979_s1 = smov 48  }
   0x7   :  { %50 = vadd.xlane.f32.xlu0 %v49_v3  ;;  %183 = vmatpush1.bf16.msra.mxu0 %v3814_v18  ;;  %s3983_s29 = smov 16   ;;  %s3984_s30 = smov 80  }
   0x8   :  { %184 = vmatprep.subr.bf16.mxu0 %v3815_v19  ;;  %v230_v27 = vrot.slane %v4093_v26, %v4088_v25  ;;  %v76_v38 = vrot.slane %v42_v35, %v4099_v34  ;;  %v82_v42 = vrot.slane %v42_v35, %v4088_v25  ;;  %v244_v50 = vrot.slane %v4093_v26, %v243_v48 }
   0x9   :  { %v218_v61 = vrot.slane %v4093_v26, %v4099_v34 }
   0xb   :  { %185 = vmatpush1.bf16.msra.mxu0 %v3817_v20 }
   0xc   :  { %186 = vmatprep.subr.bf16.mxu0 %v3818_v21 }
   0xf   :  { %187 = vmatpush1.bf16.msra.mxu0 %v3820_v22 }
  0x10   :  { %3477 = vmatprep.subr.bf16.mxu0 %v3977_v47 }
  0x1d   :  { %232 = vrot.lane.b32.xlu0 %v230_v27, %s3976_s24 }
  0x8c   :  { %v48_v4 = vpop.xlane.xlu0 %47 }
  0x8d   :  { %v53_v5 = vmul.f32 0.015625, %v48_v4 }
  0x8f   :  { %v55_v6 = vsub.f32 %v43_v0, %v53_v5 }
  0x90   :  { %v51_v7 = vpop.xlane.xlu0 %50 }
  0x91   :  { %v54_v8 = vmul.f32 0.015625, %v51_v7  ;;  %v57_v9 = vmul.f32 %v55_v6, %v55_v6 }
  0x93   :  { %v56_v10 = vsub.f32 %v44_v1, %v54_v8  ;;  %v59_v11 = vsel %vm45_vm0, %v57_v9, 0.0 }
  0x94   :  { %60 = vadd.xlane.f32.xlu1 %v59_v11  ;;  %v233_v49 = vpop.permute.xlu0 %232 }
  0x95   :  { %v58_v12 = vmul.f32 %v56_v10, %v56_v10 }
  0x97   :  { %v62_v13 = vsel %vm45_vm0, %v58_v12, 0.0 }
  0x98   :  { %63 = vadd.xlane.f32.xlu1 %v62_v13 }
 0x11d   :  { %v61_v28 = vpop.xlane.xlu1 %60 }
 0x11e   :  { %v65_v29 = vmul.f32 0.015625, %v61_v28 }
 0x120   :  { %v67_v30 = vadd.f32 1e-12, %v65_v29 }
 0x121   :  { %v64_v31 = vpop.xlane.xlu1 %63 }
 0x122   :  { %3873 = vrsqrt.f32 %v67_v30  ;;  %v66_v32 = vmul.f32 0.015625, %v64_v31 }
 0x124   :  { %v68_v33 = vadd.f32 1e-12, %v66_v32 }
 0x126   :  { %3875 = vrsqrt.f32 %v68_v33 }
 0x12f   :  { %v3874_v36 = vpop.eup %3873 }
 0x130   :  { %v71_v37 = vmul.f32 %v3874_v36, %v55_v6 }
 0x132   :  { %v77_v41 = vmul.f32 %v76_v38, %v71_v37 }
 0x133   :  { %v3876_v39 = vpop.eup %3875 }
 0x134   :  { %v72_v40 = vmul.f32 %v3876_v39, %v56_v10  ;;  %v4106_v44 = vadd.f32 %v82_v42, %v77_v41 }
 0x136   :  { %v78_v43 = vmul.f32 %v76_v38, %v72_v40 }
 0x138   :  { %v4108_v45 = vadd.f32 %v82_v42, %v78_v43 }
 0x13a   :  { %v128_v46 = vpack.c.bf16 %v4108_v45, %v4106_v44 }
 0x13c   :  { %3192 = vmatmul.mubr.msk.bf16.vlgmr.msra.gmra.mxu0 %vm45_vm0, %v128_v46 }
 0x13d   :  { %3479 = vmatprep.mubr.msk.bf16.mxu0 %vm3978_vm1, %v3977_v47 }
 0x1fc   :  { %v206_v51 = vpop.f32.mrf.mxu0 }
 0x1fd   :  { %v235_v52 = vadd.f32 %v233_v49, %v206_v51  ;;  %v219_v0 = vadd.f32 %v218_v61, %v206_v51 }
 0x1fe   :  { %v208_v53 = vpop.f32.mrf.mxu0 }
 0x1ff   :  { %v4123_v54 = vpack.c.bf16 %v235_v52, %v235_v52  ;;  %v245_v55 = vadd.f32 %v244_v50, %v208_v53  ;;  %v4140_v3 = vpack.c.bf16 %v219_v0, %v219_v0 }
 0x200   :  { %v210_v56 = vpop.f32.mrf.mxu0 }
 0x201   :  { %v4125_v57 = vpack.c.bf16 %v245_v55, %v245_v55  ;;  %v236_v58 = vadd.f32 %v233_v49, %v210_v56  ;;  %254 = vrot.lane.b32.xlu1 %v4123_v54, %s3976_s24  ;;  %v220_v6 = vadd.f32 %v218_v61, %v210_v56 }
 0x202   :  { %v212_v1 = vpop.f32.mrf.mxu0 }
 0x203   :  { %v4129_v59 = vpack.c.bf16 %v236_v58, %v236_v58  ;;  %v384_v60 = vsel %vm382_vm2, %v4125_v57, 0  ;;  %v246_v4 = vadd.f32 %v244_v50, %v212_v1  ;;  %v4150_v8 = vpack.c.bf16 %v220_v6, %v220_v6 }
 0x204   :  { %3478 = vmatpush3.bf16.msra.mxu0 %v384_v60 }
 0x205   :  { %304 = vrot.lane.b32.xlu1 %v4129_v59, %s3976_s24  ;;  %3489 = vmatprep.subr.bf16.mxu0 %v3977_v47  ;;  %v4148_v7 = vpack.c.bf16 %v246_v4, %v246_v4 }
 0x207   :  { %v430_v9 = vsel %vm382_vm2, %v4148_v7, 0 }
 0x273   :  { %v255_v62 = vpop.permute.xlu1 %254 }
 0x274   :  { %v261_v63 = vsel %vm256_vm3, %v255_v62, 0 }
 0x275   :  { %3466 = vmatpush3.bf16.xpose.msra.mxu1 %v261_v63 }
 0x276   :  { %3471 = vmatprep.subr.bf16.mxu1 %v3977_v47 }
 0x277   :  { %v305_v2 = vpop.permute.xlu1 %304 }
 0x278   :  { %v310_v5 = vsel %vm256_vm3, %v305_v2, 0 }
 0x27c   :  { %3468 = vmatmul.mubr.msk.bf16.vlgmr.msra.gmra.mxu1 %vm256_vm3, %v4140_v3 }
 0x27d   :  { %3472 = vmatpush3.bf16.xpose.msra.mxu1 %v310_v5  ;;  %3473 = vmatprep.mubr.msk.bf16.mxu1 %vm3978_vm1, %v3977_v47 }
 0x27e   :  { %3483 = vmatprep.subr.bf16.mxu1 %v3977_v47 }
 0x284   :  { %3474 = vmatmul.mubr.msk.bf16.vlgmr.msra.gmra.mxu1 %vm256_vm3, %v4150_v8 }
 0x285   :  { %3484 = vmatpush3.bf16.msra.mxu1 %v430_v9  ;;  %3485 = vmatprep.mubr.msk.bf16.mxu1 %vm3978_vm1, %v3977_v47 }
 0x286   :  { %3495 = vmatprep.subr.bf16.mxu1 %v3977_v47 }
 0x33c   :  { %v297_v10 = vpop.f32.mrf.mxu1 }
 0x33d   :  { %v352_v11 = vmul.f32 0.25, %v297_v10 }
 0x33e   :  { %v3469_v12 = vpop.f32.mrf.mxu1 }
 0x33f   :  { %v355_v13 = vsel %vm354_vm4, %v352_v11, -inf }
 0x340   :  { %356 = vmax.xlane.f32.xlu1 %v355_v13  ;;  %v300_v14 = vpop.f32.mrf.mxu1 }
 0x342   :  { %v3470_v16 = vpop.f32.mrf.mxu1 }
 0x344   :  { %v346_v17 = vpop.f32.mrf.mxu1 }
 0x345   :  { %v353_v18 = vmul.f32 0.25, %v346_v17 }
 0x346   :  { %v3475_v19 = vpop.f32.mrf.mxu1 }
 0x347   :  { %v358_v20 = vsel %vm354_vm4, %v353_v18, -inf }
 0x348   :  { %359 = vmax.xlane.f32.xlu0 %v358_v20  ;;  %v349_v21 = vpop.f32.mrf.mxu1 }
 0x34a   :  { %v3476_v22 = vpop.f32.mrf.mxu1 }
 0x351   :  { %474 = vrot.lane.b32.xlu1 %v4123_v54, %s3979_s1 }
 0x355   :  { %472 = vrot.lane.b32.xlu1 %v4140_v3, %s3980_s26 }
 0x359   :  { %522 = vrot.lane.b32.xlu1 %v4150_v8, %s3980_s26 }
 0x3c9   :  { %v357_v23 = vpop.xlane.xlu1 %356 }
 0x3ca   :  { %v361_v27 = vsub.f32 %v352_v11, %v357_v23 }
 0x3cc   :  { %v363_v28 = vmul.f32 1.442695, %v361_v27 }
 0x3cd   :  { %v475_v41 = vpop.permute.xlu1 %474 }
 0x3ce   :  { %3877 = vpow2.f32 %v363_v28  ;;  %v480_v43 = vsel %vm256_vm3, %v475_v41, 0 }
 0x3d1   :  { %v360_v29 = vpop.xlane.xlu0 %359  ;;  %v473_v52 = vpop.permute.xlu1 %472 }
 0x3d2   :  { %v362_v30 = vsub.f32 %v353_v18, %v360_v29 }
 0x3d4   :  { %v365_v31 = vmul.f32 1.442695, %v362_v30 }
 0x3d5   :  { %v523_v55 = vpop.permute.xlu1 %522 }
 0x3d6   :  { %3879 = vpow2.f32 %v365_v31 }
 0x3db   :  { %v3878_v32 = vpop.eup %3877 }
 0x3dc   :  { %v367_v33 = vsel %vm354_vm4, %v3878_v32, 0.0 }
 0x3dd   :  { %368 = vadd.xlane.f32.xlu0 %v367_v33 }
 0x3e3   :  { %v3880_v35 = vpop.eup %3879 }
 0x3e4   :  { %v370_v36 = vsel %vm354_vm4, %v3880_v35, 0.0 }
 0x3e5   :  { %371 = vadd.xlane.f32.xlu0 %v370_v36 }
 0x3fb   :  { %524 = vrot.lane.b32.xlu0 %v4129_v59, %s3979_s1 }
 0x466   :  { %v369_v37 = vpop.xlane.xlu0 %368 }
 0x467   :  { %3881 = vrcp.f32 %v369_v37 }
 0x46e   :  { %v372_v38 = vpop.xlane.xlu0 %371 }
 0x46f   :  { %3883 = vrcp.f32 %v372_v38 }
 0x472   :  { %v525_v50 = vpop.permute.xlu0 %524 }
 0x473   :  { %v530_v53 = vsel %vm256_vm3, %v525_v50, 0 }
 0x474   :  { %v3882_v39 = vpop.eup %3881 }
 0x475   :  { %v375_v40 = vmul.f32 %v3882_v39, %v3878_v32 }
 0x477   :  { %v377_v42 = vpack.c.bf16 %v375_v40, %v375_v40 }
 0x479   :  { %3480 = vmatmul.mubr.msk.bf16.vlgmr.msra.gmra.mxu0 %vm354_vm4, %v377_v42 }
 0x47a   :  { %3490 = vmatpush3.bf16.xpose.msra.mxu0 %v480_v43  ;;  %3491 = vmatprep.mubr.msk.bf16.mxu0 %vm3978_vm1, %v3977_v47 }
 0x47b   :  { %3501 = vmatprep.subr.bf16.mxu0 %v3977_v47 }
 0x47c   :  { %v3884_v46 = vpop.eup %3883 }
 0x47d   :  { %v376_v49 = vmul.f32 %v3884_v46, %v3880_v35 }
 0x47f   :  { %v378_v51 = vpack.c.bf16 %v376_v49, %v376_v49 }
 0x481   :  { %3486 = vmatmul.mubr.msk.bf16.vlgmr.msra.gmra.mxu1 %vm354_vm4, %v378_v51  ;;  %3492 = vmatmul.mubr.msk.bf16.vlgmr.msra.gmra.mxu0 %vm256_vm3, %v473_v52 }
 0x482   :  { %3496 = vmatpush3.bf16.xpose.msra.mxu1 %v530_v53  ;;  %3497 = vmatprep.mubr.msk.bf16.mxu1 %vm3978_vm1, %v3977_v47 }
 0x483   :  { %3507 = vmatprep.subr.bf16.mxu1 %v3977_v47  ;;  %3503 = vmatprep.mubr.msk.bf16.mxu0 %vm3978_vm1, %v3977_v47 }
 0x489   :  { %3498 = vmatmul.mubr.msk.bf16.vlgmr.msra.gmra.mxu1 %vm256_vm3, %v523_v55 }
 0x48a   :  { %3509 = vmatprep.mubr.msk.bf16.mxu1 %vm3978_vm1, %v3977_v47 }
 0x539   :  { %v4187_v56 = vpop.f32.mrf.mxu0 }
 0x53b   :  { %v3481_v58 = vpop.f32.mrf.mxu0 }
 0x53d   :  { %v423_v60 = vpop.f32.mrf.mxu0 }
 0x53f   :  { %v3482_v61 = vpop.f32.mrf.mxu0 }
 0x541   :  { %v4189_v62 = vpop.f32.mrf.mxu1  ;;  %v516_v63 = vpop.f32.mrf.mxu0 }
 0x542   :  { %v572_v0 = vmul.f32 0.25, %v516_v63 }
 0x543   :  { %v3487_v1 = vpop.f32.mrf.mxu1  ;;  %v3493_v2 = vpop.f32.mrf.mxu0 }
 0x544   :  { %v574_v4 = vsel %vm354_vm4, %v572_v0, -inf }
 0x545   :  { %v469_v5 = vpop.f32.mrf.mxu1  ;;  %575 = vmax.xlane.f32.xlu1 %v574_v4  ;;  %v519_v6 = vpop.f32.mrf.mxu0 }
 0x547   :  { %v3488_v9 = vpop.f32.mrf.mxu1  ;;  %v3494_v10 = vpop.f32.mrf.mxu0 }
 0x549   :  { %v566_v11 = vpop.f32.mrf.mxu1 }
 0x54a   :  { %v573_v12 = vmul.f32 0.25, %v566_v11 }
 0x54b   :  { %v3499_v13 = vpop.f32.mrf.mxu1 }
 0x54c   :  { %v577_v14 = vsel %vm354_vm4, %v573_v12, -inf }
 0x54d   :  { %578 = vmax.xlane.f32.xlu0 %v577_v14  ;;  %v569_v16 = vpop.f32.mrf.mxu1 }
 0x54f   :  { %v3500_v17 = vpop.f32.mrf.mxu1 }
 0x556   :  { %598 = vrot.lane.b32.xlu1 %v4125_v57, %s3980_s26 }
 0x55a   :  { %696 = vrot.lane.b32.xlu1 %v4123_v54, %s3981_s27 }
 0x55e   :  { %746 = vrot.lane.b32.xlu1 %v4129_v59, %s3981_s27 }
 0x562   :  { %694 = vrot.lane.b32.xlu1 %v4140_v3, %s3982_s28 }
 0x5ce   :  { %v576_v18 = vpop.xlane.xlu1 %575 }
 0x5cf   :  { %v580_v19 = vsub.f32 %v572_v0, %v576_v18 }
 0x5d1   :  { %v582_v20 = vmul.f32 1.442695, %v580_v19 }
 0x5d2   :  { %v599_v21 = vpop.permute.xlu1 %598 }
 0x5d3   :  { %3885 = vpow2.f32 %v582_v20  ;;  %v604_v22 = vsel %vm382_vm2, %v599_v21, 0 }
 0x5d4   :  { %3502 = vmatpush3.bf16.msra.mxu0 %v604_v22 }
 0x5d5   :  { %3513 = vmatprep.subr.bf16.mxu0 %v3977_v47 }
 0x5d6   :  { %v579_v23 = vpop.xlane.xlu0 %578  ;;  %v697_v39 = vpop.permute.xlu1 %696 }
 0x5d7   :  { %v581_v27 = vsub.f32 %v573_v12, %v579_v23  ;;  %v702_v42 = vsel %vm256_vm3, %v697_v39, 0 }
 0x5d9   :  { %v584_v28 = vmul.f32 1.442695, %v581_v27 }
 0x5da   :  { %v747_v43 = vpop.permute.xlu1 %746 }
 0x5db   :  { %3887 = vpow2.f32 %v584_v28  ;;  %v752_v52 = vsel %vm256_vm3, %v747_v43, 0 }
 0x5de   :  { %v695_v51 = vpop.permute.xlu1 %694 }
 0x5e0   :  { %v3886_v29 = vpop.eup %3885 }
 0x5e1   :  { %v586_v30 = vsel %vm354_vm4, %v3886_v29, 0.0 }
 0x5e2   :  { %587 = vadd.xlane.f32.xlu0 %v586_v30 }
 0x5e8   :  { %v3888_v31 = vpop.eup %3887 }
 0x5e9   :  { %v589_v32 = vsel %vm354_vm4, %v3888_v31, 0.0 }
 0x5ea   :  { %590 = vadd.xlane.f32.xlu0 %v589_v32 }
 0x600   :  { %646 = vrot.lane.b32.xlu0 %v4148_v7, %s3980_s26 }
 0x604   :  { %744 = vrot.lane.b32.xlu0 %v4150_v8, %s3982_s28 }
 0x66b   :  { %v588_v33 = vpop.xlane.xlu0 %587 }
 0x66c   :  { %3889 = vrcp.f32 %v588_v33 }
 0x673   :  { %v591_v35 = vpop.xlane.xlu0 %590 }
 0x674   :  { %3891 = vrcp.f32 %v591_v35 }
 0x677   :  { %v647_v36 = vpop.permute.xlu0 %646 }
 0x678   :  { %v652_v37 = vsel %vm382_vm2, %v647_v36, 0 }
 0x679   :  { %v3890_v38 = vpop.eup %3889  ;;  %3508 = vmatpush3.bf16.msra.mxu1 %v652_v37 }
 0x67a   :  { %v594_v40 = vmul.f32 %v3890_v38, %v3886_v29  ;;  %3519 = vmatprep.subr.bf16.mxu1 %v3977_v47 }
 0x67b   :  { %v745_v53 = vpop.permute.xlu0 %744 }
 0x67c   :  { %v596_v41 = vpack.c.bf16 %v594_v40, %v594_v40 }
 0x67e   :  { %3504 = vmatmul.mubr.msk.bf16.vlgmr.msra.gmra.mxu0 %vm354_vm4, %v596_v41 }
 0x67f   :  { %3514 = vmatpush3.bf16.xpose.msra.mxu0 %v702_v42  ;;  %3515 = vmatprep.mubr.msk.bf16.mxu0 %vm3978_vm1, %v3977_v47 }
 0x680   :  { %3525 = vmatprep.subr.bf16.mxu0 %v3977_v47 }
 0x681   :  { %v3892_v46 = vpop.eup %3891 }
 0x682   :  { %v595_v49 = vmul.f32 %v3892_v46, %v3888_v31 }
 0x684   :  { %v597_v50 = vpack.c.bf16 %v595_v49, %v595_v49 }
 0x686   :  { %3510 = vmatmul.mubr.msk.bf16.vlgmr.msra.gmra.mxu1 %vm354_vm4, %v597_v50  ;;  %3516 = vmatmul.mubr.msk.bf16.vlgmr.msra.gmra.mxu0 %vm256_vm3, %v695_v51 }
 0x687   :  { %3520 = vmatpush3.bf16.xpose.msra.mxu1 %v752_v52  ;;  %3521 = vmatprep.mubr.msk.bf16.mxu1 %vm3978_vm1, %v3977_v47 }
 0x688   :  { %3531 = vmatprep.subr.bf16.mxu1 %v3977_v47  ;;  %3527 = vmatprep.mubr.msk.bf16.mxu0 %vm3978_vm1, %v3977_v47 }
 0x68e   :  { %3522 = vmatmul.mubr.msk.bf16.vlgmr.msra.gmra.mxu1 %vm256_vm3, %v745_v53 }
 0x68f   :  { %3533 = vmatprep.mubr.msk.bf16.mxu1 %vm3978_vm1, %v3977_v47 }
 0x73e   :  { %v4227_v55 = vpop.f32.mrf.mxu0 }
 0x740   :  { %v3505_v58 = vpop.f32.mrf.mxu0 }
 0x742   :  { %v643_v60 = vpop.f32.mrf.mxu0 }
 0x744   :  { %v3506_v61 = vpop.f32.mrf.mxu0 }
 0x746   :  { %v4229_v63 = vpop.f32.mrf.mxu1  ;;  %v738_v0 = vpop.f32.mrf.mxu0 }
 0x747   :  { %v3779_v1 = vpack.i.bf16 %v4229_v63, %v4227_v55  ;;  %v794_v2 = vmul.f32 0.25, %v738_v0 }
 0x748   :  { %v3511_v4 = vpop.f32.mrf.mxu1  ;;  %v3517_v5 = vpop.f32.mrf.mxu0 }
 0x749   :  { %v796_v6 = vsel %vm354_vm4, %v794_v2, -inf }
 0x74a   :  { %v691_v9 = vpop.f32.mrf.mxu1  ;;  %797 = vmax.xlane.f32.xlu1 %v796_v6  ;;  %v741_v10 = vpop.f32.mrf.mxu0 }
 0x74c   :  { %v3512_v11 = vpop.f32.mrf.mxu1  ;;  %v3518_v12 = vpop.f32.mrf.mxu0 }
 0x74e   :  { %v788_v13 = vpop.f32.mrf.mxu1 }
 0x74f   :  { %v795_v14 = vmul.f32 0.25, %v788_v13 }
 0x750   :  { %v3523_v16 = vpop.f32.mrf.mxu1 }
 0x751   :  { %v799_v17 = vsel %vm354_vm4, %v795_v14, -inf }
 0x752   :  { %800 = vmax.xlane.f32.xlu0 %v799_v17  ;;  %v791_v18 = vpop.f32.mrf.mxu1 }
 0x754   :  { %v3524_v19 = vpop.f32.mrf.mxu1 }
 0x75b   :  { %820 = vrot.lane.b32.xlu1 %v4125_v57, %s3982_s28 }
 0x75f   :  { %918 = vrot.lane.b32.xlu1 %v4123_v54, %s3983_s29 }
 0x763   :  { %968 = vrot.lane.b32.xlu1 %v4129_v59, %s3983_s29 }
 0x767   :  { %916 = vrot.lane.b32.xlu1 %v4140_v3, %s3984_s30 }
 0x7d3   :  { %v798_v20 = vpop.xlane.xlu1 %797 }
 0x7d4   :  { %v802_v21 = vsub.f32 %v794_v2, %v798_v20 }
 0x7d6   :  { %v804_v22 = vmul.f32 1.442695, %v802_v21 }
 0x7d7   :  { %v821_v23 = vpop.permute.xlu1 %820 }
 0x7d8   :  { %3893 = vpow2.f32 %v804_v22  ;;  %v826_v27 = vsel %vm382_vm2, %v821_v23, 0 }
 0x7d9   :  { %3526 = vmatpush3.bf16.msra.mxu0 %v826_v27 }
 0x7da   :  { %3537 = vmatprep.subr.bf16.mxu0 %v3977_v47 }
 0x7db   :  { %v801_v28 = vpop.xlane.xlu0 %800  ;;  %v919_v38 = vpop.permute.xlu1 %918 }
 0x7dc   :  { %v803_v29 = vsub.f32 %v795_v14, %v801_v28  ;;  %v924_v41 = vsel %vm256_vm3, %v919_v38, 0 }
 0x7de   :  { %v806_v54 = vmul.f32 1.442695, %v803_v29 }
 0x7df   :  { %v969_v42 = vpop.permute.xlu1 %968 }
 0x7e0   :  { %3895 = vpow2.f32 %v806_v54  ;;  %v974_v50 = vsel %vm256_vm3, %v969_v42, 0  ;;  %v3824_v42 = vld [vmem:[%s4799_s3] sm:$0xff]  }
 0x7e3   :  { %v917_v49 = vpop.permute.xlu1 %916 }
 0x7e5   :  { %v3894_v30 = vpop.eup %3893 }
 0x7e6   :  { %v808_v59 = vsel %vm354_vm4, %v3894_v30, 0.0 }
 0x7e7   :  { %809 = vadd.xlane.f32.xlu0 %v808_v59 }
 0x7ed   :  { %v3896_v31 = vpop.eup %3895 }
 0x7ee   :  { %v811_v3 = vsel %vm354_vm4, %v3896_v31, 0.0 }
 0x7ef   :  { %812 = vadd.xlane.f32.xlu0 %v811_v3 }
 0x805   :  { %868 = vrot.lane.b32.xlu0 %v4148_v7, %s3982_s28 }
 0x809   :  { %966 = vrot.lane.b32.xlu0 %v4150_v8, %s3984_s30 }
 0x870   :  { %v810_v32 = vpop.xlane.xlu0 %809 }
 0x871   :  { %3897 = vrcp.f32 %v810_v32 }
 0x878   :  { %v813_v33 = vpop.xlane.xlu0 %812 }
 0x879   :  { %3899 = vrcp.f32 %v813_v33 }
 0x87c   :  { %v869_v35 = vpop.permute.xlu0 %868 }
 0x87d   :  { %v874_v36 = vsel %vm382_vm2, %v869_v35, 0 }
 0x87e   :  { %v3898_v37 = vpop.eup %3897  ;;  %3532 = vmatpush3.bf16.msra.mxu1 %v874_v36 }
 0x87f   :  { %v816_v39 = vmul.f32 %v3898_v37, %v3894_v30  ;;  %3543 = vmatprep.subr.bf16.mxu1 %v3977_v47 }
 0x880   :  { %v967_v51 = vpop.permute.xlu0 %966 }
 0x881   :  { %v818_v40 = vpack.c.bf16 %v816_v39, %v816_v39  ;;  %v3821_v39 = vld [vmem:[%s4799_s3 + $0x18] sm:$0xff]  }
 0x883   :  { %3528 = vmatmul.mubr.msk.bf16.vlgmr.msra.gmra.mxu0 %vm354_vm4, %v818_v40  ;;  %v3822_v40 = vld [vmem:[%s4799_s3 + $0x10] sm:$0xff]  }
 0x884   :  { %3538 = vmatpush3.bf16.xpose.msra.mxu0 %v924_v41  ;;  %3539 = vmatprep.mubr.msk.bf16.mxu0 %vm3978_vm1, %v3977_v47  ;;  %v3823_v41 = vld [vmem:[%s4799_s3 + $0x8] sm:$0xff]  }
 0x885   :  { %3549 = vmatprep.subr.bf16.mxu0 %v3977_v47 }
 0x886   :  { %v3900_v8 = vpop.eup %3899 }
 0x887   :  { %v817_v43 = vmul.f32 %v3900_v8, %v3896_v31 }
 0x889   :  { %v819_v46 = vpack.c.bf16 %v817_v43, %v817_v43 }
 0x88b   :  { %3534 = vmatmul.mubr.msk.bf16.vlgmr.msra.gmra.mxu1 %vm354_vm4, %v819_v46  ;;  %3540 = vmatmul.mubr.msk.bf16.vlgmr.msra.gmra.mxu0 %vm256_vm3, %v917_v49 }
 0x88c   :  { %3544 = vmatpush3.bf16.xpose.msra.mxu1 %v974_v50  ;;  %3545 = vmatprep.mubr.msk.bf16.mxu1 %vm3978_vm1, %v3977_v47 }
 0x88d   :  { %3555 = vmatprep.subr.bf16.mxu1 %v3977_v47  ;;  %3551 = vmatprep.mubr.msk.bf16.mxu0 %vm3978_vm1, %v3977_v47 }
 0x893   :  { %3546 = vmatmul.mubr.msk.bf16.vlgmr.msra.gmra.mxu1 %vm256_vm3, %v967_v51 }
 0x894   :  { %3557 = vmatprep.mubr.msk.bf16.mxu1 %vm3978_vm1, %v3977_v47 }
 0x943   :  { %v862_v52 = vpop.f32.mrf.mxu0 }
 0x945   :  { %v3529_v53 = vpop.f32.mrf.mxu0 }
 0x947   :  { %v865_v58 = vpop.f32.mrf.mxu0 }
 0x949   :  { %v3530_v60 = vpop.f32.mrf.mxu0 }
 0x94b   :  { %v910_v61 = vpop.f32.mrf.mxu1  ;;  %v960_v0 = vpop.f32.mrf.mxu0 }
 0x94c   :  { %v1016_v2 = vmul.f32 0.25, %v960_v0  ;;  %v3784_v20 = vpack.i.bf16 %v910_v61, %v862_v52 }
 0x94d   :  { %v3535_v4 = vpop.f32.mrf.mxu1  ;;  %v3541_v5 = vpop.f32.mrf.mxu0 }
 0x94e   :  { %v1018_v6 = vsel %vm354_vm4, %v1016_v2, -inf }
 0x94f   :  { %v913_v9 = vpop.f32.mrf.mxu1  ;;  %1019 = vmax.xlane.f32.xlu1 %v1018_v6  ;;  %v963_v10 = vpop.f32.mrf.mxu0 }
 0x951   :  { %v3536_v11 = vpop.f32.mrf.mxu1  ;;  %v3542_v12 = vpop.f32.mrf.mxu0 }
 0x953   :  { %v1010_v13 = vpop.f32.mrf.mxu1 }
 0x954   :  { %v1017_v14 = vmul.f32 0.25, %v1010_v13 }
 0x955   :  { %v3547_v16 = vpop.f32.mrf.mxu1 }
 0x956   :  { %v1021_v17 = vsel %vm354_vm4, %v1017_v14, -inf }
 0x957   :  { %1022 = vmax.xlane.f32.xlu0 %v1021_v17  ;;  %v1013_v18 = vpop.f32.mrf.mxu1 }
 0x959   :  { %v3548_v19 = vpop.f32.mrf.mxu1 }
 0x960   :  { %1042 = vrot.lane.b32.xlu1 %v4125_v57, %s3984_s30 }
 0x964   :  { %3780 = vrot.lane.b32.xlu1 %v3779_v1, %s3983_s29 }
 0x968   :  { %3785 = vrot.lane.b32.xlu1 %v3784_v20, %s3981_s27 }
 0x9d8   :  { %v1020_v21 = vpop.xlane.xlu1 %1019 }
 0x9d9   :  { %v1024_v22 = vsub.f32 %v1016_v2, %v1020_v21 }
 0x9db   :  { %v1026_v23 = vmul.f32 1.442695, %v1024_v22 }
 0x9dc   :  { %v1043_v27 = vpop.permute.xlu1 %1042 }
 0x9dd   :  { %3901 = vpow2.f32 %v1026_v23  ;;  %v1048_v28 = vsel %vm382_vm2, %v1043_v27, 0 }
 0x9de   :  { %3550 = vmatpush3.bf16.msra.mxu0 %v1048_v28 }
 0x9df   :  { %3561 = vmatprep.subr.bf16.mxu0 %v3977_v47 }
 0x9e0   :  { %v1023_v29 = vpop.xlane.xlu0 %1022  ;;  %v3781_v60 = vpop.permute.xlu1 %3780 }
 0x9e1   :  { %v1025_v57 = vsub.f32 %v1017_v14, %v1023_v29  ;;  %v3783_v0 = vunpack.i.h.bf16 %v3781_v60  ;;  %v3782_v2 = vunpack.i.l.bf16 %v3781_v60 }
 0x9e3   :  { %v1028_v54 = vmul.f32 1.442695, %v1025_v57  ;;  %v1163_v9 = vsel %vm256_vm3, %v4189_v62, %v3783_v0  ;;  %v1162_v10 = vsel %vm256_vm3, %v4187_v56, %v3782_v2  ;;  %v1173_v62 = vsub.s32 3, %v4085_v24 }
 0x9e4   :  { %v3786_v61 = vpop.permute.xlu1 %3785 }
 0x9e5   :  { %3903 = vpow2.f32 %v1028_v54  ;;  %v3788_v4 = vunpack.i.h.bf16 %v3786_v61  ;;  %v3787_v5 = vunpack.i.l.bf16 %v3786_v61  ;;  %v1174_v56 = vrot.slane %v4093_v26, %v1173_v62 }
 0x9e7   :  { %v1165_v13 = vsel %vm1164_vm5, %v1162_v10, %v3787_v5  ;;  %v1166_v14 = vsel %vm1164_vm5, %v1163_v9, %v3788_v4  ;;  %v3829_v4 = vld [vmem:[%s4801_s5 + $0x38] sm:$0xff]   ;;  %v3831_v5 = vld [vmem:[%s4801_s5 + $0x28] sm:$0xff]   ;;  %v3834_v9 = vld [vmem:[%s4801_s5 + $0x10] sm:$0xff]  }
 0x9e8   :  { %v3835_v10 = vld [vmem:[%s4801_s5 + $0x8] sm:$0xff]  }
 0x9ea   :  { %v3902_v30 = vpop.eup %3901 }
 0x9eb   :  { %v1030_v55 = vsel %vm354_vm4, %v3902_v30, 0.0 }
 0x9ec   :  { %1031 = vadd.xlane.f32.xlu0 %v1030_v55 }
 0x9f2   :  { %v3904_v63 = vpop.eup %3903 }
 0x9f3   :  { %v1033_v1 = vsel %vm354_vm4, %v3904_v63, 0.0 }
 0x9f4   :  { %1034 = vadd.xlane.f32.xlu0 %v1033_v1 }
 0xa0a   :  { %1090 = vrot.lane.b32.xlu0 %v4148_v7, %s3984_s30 }
 0xa75   :  { %v1032_v59 = vpop.xlane.xlu0 %1031 }
 0xa76   :  { %3905 = vrcp.f32 %v1032_v59 }
 0xa7d   :  { %v1035_v31 = vpop.xlane.xlu0 %1034 }
 0xa7e   :  { %3907 = vrcp.f32 %v1035_v31 }
 0xa81   :  { %v1091_v3 = vpop.permute.xlu0 %1090 }
 0xa82   :  { %v1096_v32 = vsel %vm382_vm2, %v1091_v3, 0 }
 0xa83   :  { %v3906_v33 = vpop.eup %3905  ;;  %3556 = vmatpush3.bf16.msra.mxu1 %v1096_v32 }
 0xa84   :  { %v1038_v35 = vmul.f32 %v3906_v33, %v3902_v30  ;;  %3573 = vmatprep.subr.bf16.mxu1 %v3977_v47 }
 0xa86   :  { %v1040_v36 = vpack.c.bf16 %v1038_v35, %v1038_v35  ;;  %v3826_v35 = vld [vmem:[%s4800_s4 + $0x10] sm:$0xff]  }
 0xa88   :  { %3552 = vmatmul.mubr.msk.bf16.vlgmr.msra.gmra.mxu0 %vm354_vm4, %v1040_v36  ;;  %v3827_v36 = vld [vmem:[%s4800_s4 + $0x8] sm:$0xff]  }
 0xa89   :  { %3569 = vmatprep.mubr.msk.bf16.mxu0 %vm3978_vm1, %v3977_v47  ;;  %3562 = vmatpush3.bf16.msra.mxu0 %v3821_v39 }
 0xa8a   :  { %3563 = vmatprep.subr.bf16.mxu0 %v3977_v47 }
 0xa8b   :  { %v3908_v37 = vpop.eup %3907 }
 0xa8c   :  { %v1039_v7 = vmul.f32 %v3908_v37, %v3904_v63  ;;  %v3828_v37 = vld [vmem:[%s4800_s4] sm:$0xff]  }
 0xa8d   :  { %3564 = vmatpush3.bf16.msra.mxu0 %v3822_v40 }
 0xa8e   :  { %v1041_v38 = vpack.c.bf16 %v1039_v7, %v1039_v7  ;;  %3565 = vmatprep.subr.bf16.mxu0 %v3977_v47 }
 0xa90   :  { %3558 = vmatmul.mubr.msk.bf16.vlgmr.msra.gmra.mxu1 %vm354_vm4, %v1041_v38 }
 0xa91   :  { %3581 = vmatprep.mubr.msk.bf16.mxu1 %vm3978_vm1, %v3977_v47  ;;  %3566 = vmatpush3.bf16.msra.mxu0 %v3823_v41 }
 0xa92   :  { %3567 = vmatprep.subr.bf16.mxu0 %v3977_v47 }
 0xa95   :  { %3568 = vmatpush3.bf16.msra.mxu0 %v3824_v42 }
 0xa96   :  { %3585 = vmatprep.subr.bf16.mxu0 %v3977_v47 }
 0xb48   :  { %v1084_v8 = vpop.f32.mrf.mxu0 }
 0xb4a   :  { %v3553_v43 = vpop.f32.mrf.mxu0 }
 0xb4c   :  { %v1087_v46 = vpop.f32.mrf.mxu0 }
 0xb4e   :  { %v3554_v49 = vpop.f32.mrf.mxu0 }
 0xb50   :  { %v1132_v50 = vpop.f32.mrf.mxu1 }
 0xb51   :  { %v3789_v51 = vpack.i.bf16 %v1132_v50, %v1084_v8  ;;  %v1273_v8 = vsub.s32 4, %v4085_v24  ;;  %v1279_v50 = vsub.s32 5, %v4085_v24 }
 0xb52   :  { %v3559_v52 = vpop.f32.mrf.mxu1 }
 0xb53   :  { %3790 = vrot.lane.b32.xlu1 %v3789_v51, %s3979_s1  ;;  %v1274_v49 = vrot.slane %v4093_v26, %v1273_v8 }
 0xb54   :  { %v1135_v53 = vpop.f32.mrf.mxu1 }
 0xb56   :  { %v3560_v58 = vpop.f32.mrf.mxu1 }
 0xb57   :  { %v1280_v58 = vrot.slane %v4093_v26, %v1279_v50  ;;  %v3830_v26 = vld [vmem:[%s4801_s5 + $0x30] sm:$0xff]  }
 0xbc5   :  { %v3791_v6 = vpop.permute.xlu1 %3790 }
 0xbc6   :  { %v3793_v11 = vunpack.i.h.bf16 %v3791_v6  ;;  %v3792_v12 = vunpack.i.l.bf16 %v3791_v6  ;;  %v3833_v6 = vld [vmem:[%s4801_s5 + $0x18] sm:$0xff]  }
 0xbc8   :  { %v1169_v16 = vsel %vm1167_vm6, %v1166_v14, %v3793_v11  ;;  %v1168_v17 = vsel %vm1167_vm6, %v1165_v13, %v3792_v12  ;;  %v3836_v11 = vld [vmem:[%s4801_s5] sm:$0xff]  }
 0xbc9   :  { %v1170_v18 = vpack.c.bf16 %v1169_v16, %v1168_v17  ;;  %v3220_v12 = vld [vmem:[%s4802_s7] ss:$0 sm:$0xff] }
 0xbcb   :  { %3570 = vmatmul.mubr.msk.bf16.vlgmr.msra.gmra.mxu0 %vm45_vm0, %v1170_v18 }
 0xbcc   :  { %3601 = vmatprep.mubr.msk.bf16.mxu0 %vm3978_vm1, %v3977_v47  ;;  %3586 = vmatpush3.bf16.msra.mxu0 %v3829_v4 }
 0xbcd   :  { %3587 = vmatprep.subr.bf16.mxu0 %v3977_v47 }
 0xbd0   :  { %3588 = vmatpush3.bf16.msra.mxu0 %v3830_v26 }
 0xbd1   :  { %3589 = vmatprep.subr.bf16.mxu0 %v3977_v47 }
 0xbd4   :  { %3590 = vmatpush3.bf16.msra.mxu0 %v3831_v5 }
 0xbd5   :  { %3591 = vmatprep.subr.bf16.mxu0 %v3977_v47 }
 0xc8b   :  { %v1236_v19 = vpop.f32.mrf.mxu0 }
 0xc8c   :  { %v1237_v20 = vadd.f32 %v1236_v19, %v1174_v56 }
 0xc8d   :  { %v3571_v21 = vpop.f32.mrf.mxu0 }
 0xc8e   :  { %v1243_v22 = vadd.f32 %v1237_v20, %v4106_v44 }
 0xc8f   :  { %v1239_v23 = vpop.f32.mrf.mxu0 }
 0xc90   :  { %v1240_v27 = vadd.f32 %v1239_v23, %v1174_v56  ;;  %v1245_v28 = vsel %vm45_vm0, %v1243_v22, 0.0 }
 0xc91   :  { %1246 = vadd.xlane.f32.xlu0 %v1245_v28  ;;  %v3572_v29 = vpop.f32.mrf.mxu0 }
 0xc92   :  { %v1244_v57 = vadd.f32 %v1240_v27, %v4108_v45  ;;  %v3825_v45 = vld [vmem:[%s4800_s4 + $0x18] sm:$0xff]  }
 0xc93   :  { %3574 = vmatpush3.bf16.msra.mxu1 %v3825_v45 }
 0xc94   :  { %v1248_v54 = vsel %vm45_vm0, %v1244_v57, 0.0  ;;  %3575 = vmatprep.subr.bf16.mxu1 %v3977_v47 }
 0xc95   :  { %1249 = vadd.xlane.f32.xlu1 %v1248_v54 }
 0xc97   :  { %3576 = vmatpush3.bf16.msra.mxu1 %v3826_v35 }
 0xc98   :  { %3577 = vmatprep.subr.bf16.mxu1 %v3977_v47 }
 0xc9b   :  { %3578 = vmatpush3.bf16.msra.mxu1 %v3827_v36 }
 0xc9c   :  { %3579 = vmatprep.subr.bf16.mxu1 %v3977_v47 }
 0xc9f   :  { %3580 = vmatpush3.bf16.msra.mxu1 %v3828_v37 }
 0xd1a   :  { %v1247_v30 = vpop.xlane.xlu0 %1246 }
 0xd1b   :  { %v1251_v55 = vmul.f32 0.015625, %v1247_v30 }
 0xd1d   :  { %v1253_v63 = vsub.f32 %v1243_v22, %v1251_v55 }
 0xd1e   :  { %v1250_v1 = vpop.xlane.xlu1 %1249 }
 0xd1f   :  { %v1252_v59 = vmul.f32 0.015625, %v1250_v1  ;;  %v1255_v31 = vmul.f32 %v1253_v63, %v1253_v63 }
 0xd21   :  { %v1254_v3 = vsub.f32 %v1244_v57, %v1252_v59  ;;  %v1257_v44 = vsel %vm45_vm0, %v1255_v31, 0.0 }
 0xd22   :  { %1258 = vadd.xlane.f32.xlu0 %v1257_v44 }
 0xd23   :  { %v1256_v32 = vmul.f32 %v1254_v3, %v1254_v3 }
 0xd25   :  { %v1260_v33 = vsel %vm45_vm0, %v1256_v32, 0.0 }
 0xd26   :  { %1261 = vadd.xlane.f32.xlu0 %v1260_v33 }
 0xdab   :  { %v1259_v7 = vpop.xlane.xlu0 %1258 }
 0xdac   :  { %v1263_v38 = vmul.f32 0.015625, %v1259_v7 }
 0xdae   :  { %v1265_v39 = vadd.f32 1e-12, %v1263_v38 }
 0xdaf   :  { %v1262_v40 = vpop.xlane.xlu0 %1261 }
 0xdb0   :  { %3909 = vrsqrt.f32 %v1265_v39  ;;  %v1264_v41 = vmul.f32 0.015625, %v1262_v40 }
 0xdb2   :  { %v1266_v42 = vadd.f32 1e-12, %v1264_v41 }
 0xdb4   :  { %3911 = vrsqrt.f32 %v1266_v42 }
 0xdbd   :  { %v3910_v43 = vpop.eup %3909 }
 0xdbe   :  { %v1269_v46 = vmul.f32 %v3910_v43, %v1253_v63 }
 0xdc0   :  { %v1275_v53 = vmul.f32 %v1274_v49, %v1269_v46 }
 0xdc1   :  { %v3912_v51 = vpop.eup %3911 }
 0xdc2   :  { %v1270_v52 = vmul.f32 %v3912_v51, %v1254_v3  ;;  %v4353_v61 = vadd.f32 %v1280_v58, %v1275_v53 }
 0xdc4   :  { %v1276_v60 = vmul.f32 %v1274_v49, %v1270_v52 }
 0xdc6   :  { %v4355_v0 = vadd.f32 %v1280_v58, %v1276_v60 }
 0xdc8   :  { %v1283_v2 = vpack.c.bf16 %v4355_v0, %v4353_v61 }
 0xdca   :  { %3582 = vmatmul.mubr.msk.bf16.vlgmr.msra.gmra.mxu1 %vm45_vm0, %v1283_v2 }
 0xdcb   :  { %1671 = vmatprep.mubr.bf16.mxu1 %v3975_v15  ;;  %v3832_v15 = vld [vmem:[%s4801_s5 + $0x20] sm:$0xff]  }
 0xdcc   :  { %3592 = vmatpush3.bf16.msra.mxu0 %v3832_v15 }
 0xdcd   :  { %3593 = vmatprep.subr.bf16.mxu0 %v3977_v47 }
 0xdd0   :  { %3594 = vmatpush3.bf16.msra.mxu0 %v3833_v6 }
 0xdd1   :  { %3595 = vmatprep.subr.bf16.mxu0 %v3977_v47 }
 0xdd4   :  { %3596 = vmatpush3.bf16.msra.mxu0 %v3834_v9 }
 0xdd5   :  { %3597 = vmatprep.subr.bf16.mxu0 %v3977_v47 }
 0xdd8   :  { %3598 = vmatpush3.bf16.msra.mxu0 %v3835_v10 }
 0xdd9   :  { %3599 = vmatprep.subr.bf16.mxu0 %v3977_v47 }
 0xddc   :  { %3600 = vmatpush3.bf16.msra.mxu0 %v3836_v11 }
 0xddd   :  { %3617 = vmatprep.subr.bf16.mxu0 %v3977_v47 }
 0xe8a   :  { %v1351_v13 = vpop.f32.mrf.mxu1 }
 0xe8b   :  { %v1352_v14 = vadd.f32 %v3220_v12, %v1351_v13 }
 0xe8c   :  { %v3583_v16 = vpop.f32.mrf.mxu1 }
 0xe8d   :  { %v1360_v17 = vmul.f32 0.70710677, %v1352_v14  ;;  %v1358_v10 = vmul.f32 0.5, %v1352_v14 }
 0xe8e   :  { %v1354_v18 = vpop.f32.mrf.mxu1 }
 0xe8f   :  { %v1362_v56 = vand.u32 2147483647, %v1360_v17  ;;  %v1355_v19 = vadd.f32 %v3220_v12, %v1354_v18  ;;  %vm1402_vm7 = vcmp.lt.f32.partialorder %v1360_v17, 0.0  ;;  %v3973_v17 = vld [vmem:[%s4797_s6] sm:$0xff] }
 0xe90   :  { %v3584_v20 = vpop.f32.mrf.mxu1 }
 0xe91   :  { %v1364_v21 = vmul.f32 0.3275911, %v1362_v56  ;;  %v1361_v22 = vmul.f32 0.70710677, %v1355_v19  ;;  %v1390_v57 = vsub.f32 0.0, %v1362_v56  ;;  %v1359_v11 = vmul.f32 0.5, %v1355_v19 }
 0xe93   :  { %v1366_v23 = vadd.f32 1.0, %v1364_v21  ;;  %v1363_v27 = vand.u32 2147483647, %v1361_v22  ;;  %v1392_v54 = vmul.f32 %v1390_v57, %v1362_v56  ;;  %vm1403_vm8 = vcmp.lt.f32.partialorder %v1361_v22, 0.0 }
 0xe94   :  { %v1415_v56 = vsub.s32 6, %v4085_v24 }
 0xe95   :  { %3913 = vrcp.f32 %v1366_v23  ;;  %v1365_v28 = vmul.f32 0.3275911, %v1363_v27  ;;  %v1391_v30 = vsub.f32 0.0, %v1363_v27  ;;  %v1394_v1 = vmul.f32 1.442695, %v1392_v54 }
 0xe96   :  { %v1416_v20 = vrot.slane %v3973_v17, %v1415_v56 }
 0xe97   :  { %v1367_v29 = vadd.f32 1.0, %v1365_v28  ;;  %v1393_v59 = vmul.f32 %v1391_v30, %v1363_v27 }
 0xe99   :  { %3915 = vrcp.f32 %v1367_v29  ;;  %v1396_v33 = vmul.f32 1.442695, %v1393_v59 }
 0xe9a   :  { %3917 = vpow2.f32 %v1394_v1 }
 0xe9b   :  { %3919 = vpow2.f32 %v1396_v33  ;;  %v3837_v33 = vld [vmem:[%s4796_s2 + $0x70] ss:$8 sps:$4 sm:$0xff]  }
 0xea2   :  { %v3914_v55 = vpop.eup %3913 }
 0xea3   :  { %v1372_v63 = vmul.f32 1.0614054, %v3914_v55 }
 0xea5   :  { %v1374_v31 = vadd.f32 -1.4531521, %v1372_v63 }
 0xea6   :  { %v3916_v3 = vpop.eup %3915 }
 0xea7   :  { %v1376_v44 = vmul.f32 %v3914_v55, %v1374_v31  ;;  %v1373_v32 = vmul.f32 1.0614054, %v3916_v3  ;;  %v3918_v49 = vpop.eup %3917 }
 0xea8   :  { %v3920_v60 = vpop.eup %3919 }
 0xea9   :  { %v1378_v45 = vadd.f32 1.4214138, %v1376_v44  ;;  %v1375_v35 = vadd.f32 -1.4531521, %v1373_v32 }
 0xeab   :  { %v1380_v36 = vmul.f32 %v3914_v55, %v1378_v45  ;;  %v1377_v37 = vmul.f32 %v3916_v3, %v1375_v35  ;;  %v3842_v45 = vld [vmem:[%s4796_s2 + $0x64] ss:$8 sps:$4 sm:$0xff]   ;;  %v3840_v35 = vld [vmem:[%s4796_s2 + $0x60] ss:$8 sps:$4 sm:$0xff]  }
 0xead   :  { %v1382_v7 = vadd.f32 -0.28449672, %v1380_v36  ;;  %v1379_v38 = vadd.f32 1.4214138, %v1377_v37  ;;  %v3845_v36 = vld [vmem:[%s4796_s2 + $0x54] ss:$8 sps:$4 sm:$0xff]  }
 0xeae   :  { %v3843_v37 = vld [vmem:[%s4796_s2 + $0x50] ss:$8 sps:$4 sm:$0xff]  }
 0xeaf   :  { %v1384_v39 = vmul.f32 %v3914_v55, %v1382_v7  ;;  %v1381_v40 = vmul.f32 %v3916_v3, %v1379_v38  ;;  %v3848_v7 = vld [vmem:[%s4796_s2 + $0x44] ss:$8 sps:$4 sm:$0xff]   ;;  %v3846_v38 = vld [vmem:[%s4796_s2 + $0x40] ss:$8 sps:$4 sm:$0xff]  }
 0xeb1   :  { %v1386_v41 = vadd.f32 0.2548296, %v1384_v39  ;;  %v1383_v42 = vadd.f32 -0.28449672, %v1381_v40  ;;  %v4438_v39 = vld [vmem:[%s4797_s6 + $0x10] sm:$0xff] }
 0xeb2   :  { %v1697_v40 = vrot.slane %v4438_v39, %v4088_v25 }
 0xeb3   :  { %v1388_v43 = vmul.f32 %v3914_v55, %v1386_v41  ;;  %v1385_v46 = vmul.f32 %v3916_v3, %v1383_v42 }
 0xeb5   :  { %v1398_v51 = vmul.f32 %v3918_v49, %v1388_v43  ;;  %v1387_v52 = vadd.f32 0.2548296, %v1385_v46 }
 0xeb7   :  { %v1400_v53 = vsub.f32 1.0, %v1398_v51  ;;  %v1389_v58 = vmul.f32 %v3916_v3, %v1387_v52  ;;  %v1536_v52 = vsub.s32 7, %v4085_v24  ;;  %v3870_v24 = vld [vmem:[%s4804_s10 + $0x10] sm:$0xff]  }
 0xeb9   :  { %v1404_v2 = vsub.f32 0.0, %v1400_v53  ;;  %v1399_v4 = vmul.f32 %v3920_v60, %v1389_v58  ;;  %v1537_v60 = vrot.slane %v3973_v17, %v1536_v52 }
 0xebb   :  { %v1406_v26 = vsel %vm1402_vm7, %v1404_v2, %v1400_v53  ;;  %v1401_v5 = vsub.f32 1.0, %v1399_v4 }
 0xebc   :  { %v1408_v6 = vadd.f32 1.0, %v1406_v26  ;;  %v3234_v26 = vld [vmem:[%s4797_s6 + $0x8] ss:$0 sm:$0xff] }
 0xebd   :  { %v1405_v15 = vsub.f32 0.0, %v1401_v5 }
 0xebe   :  { %v1410_v13 = vmul.f32 %v1408_v6, %v1358_v10 }
 0xebf   :  { %v1407_v9 = vsel %vm1403_vm8, %v1405_v15, %v1401_v5 }
 0xec0   :  { %v1409_v12 = vadd.f32 1.0, %v1407_v9 }
 0xec2   :  { %v1411_v16 = vmul.f32 %v1409_v12, %v1359_v11  ;;  %v1711_v11 = vrot.slane %v4438_v39, %v243_v48  ;;  %v1685_v48 = vrot.slane %v4438_v39, %v4099_v34 }
 0xec4   :  { %v1412_v18 = vpack.c.bf16 %v1411_v16, %v1410_v13 }
 0xec6   :  { %3602 = vmatmul.mubr.bf16.vlgmr.msra.gmra.mxu0 %v1412_v18 }
 0xec7   :  { %3619 = vmatprep.mubr.msk.bf16.mxu0 %vm3978_vm1, %v3977_v47 }
 0xf86   :  { %v1499_v21 = vpop.f32.mrf.mxu0 }
 0xf87   :  { %v1500_v14 = vadd.f32 %v1499_v21, %v1416_v20 }
 0xf88   :  { %v3603_v19 = vpop.f32.mrf.mxu0 }
 0xf89   :  { %v1506_v22 = vadd.f32 %v1500_v14, %v4353_v61 }
 0xf8a   :  { %v1502_v23 = vpop.f32.mrf.mxu0 }
 0xf8b   :  { %v1503_v27 = vadd.f32 %v1502_v23, %v1416_v20  ;;  %v1508_v28 = vsel %vm45_vm0, %v1506_v22, 0.0 }
 0xf8c   :  { %1509 = vadd.xlane.f32.xlu0 %v1508_v28  ;;  %v3604_v29 = vpop.f32.mrf.mxu0 }
 0xf8d   :  { %v1507_v57 = vadd.f32 %v1503_v27, %v4355_v0  ;;  %v3839_v0 = vld [vmem:[%s4796_s2 + $0x74] ss:$8 sps:$4 sm:$0xff]  }
 0xf8e   :  { %1647 = vmatprep.subr.bf16.mxu1 %v3839_v0 }
 0xf8f   :  { %v1511_v54 = vsel %vm45_vm0, %v1507_v57, 0.0  ;;  %1648 = vmatpush1.bf16.msra.mxu1 %v3837_v33 }
 0xf90   :  { %1512 = vadd.xlane.f32.xlu1 %v1511_v54  ;;  %1649 = vmatprep.subr.bf16.mxu1 %v3842_v45 }
 0xf93   :  { %1650 = vmatpush1.bf16.msra.mxu1 %v3840_v35 }
 0xf94   :  { %1651 = vmatprep.subr.bf16.mxu1 %v3845_v36 }
 0xf97   :  { %1652 = vmatpush1.bf16.msra.mxu1 %v3843_v37 }
 0xf98   :  { %1653 = vmatprep.subr.bf16.mxu1 %v3848_v7 }
 0xf9b   :  { %1654 = vmatpush1.bf16.msra.mxu1 %v3846_v38 }
 0xf9c   :  { %3605 = vmatprep.subr.bf16.mxu1 %v3977_v47 }
0x1015   :  { %v1510_v30 = vpop.xlane.xlu0 %1509 }
0x1016   :  { %v1514_v55 = vmul.f32 0.015625, %v1510_v30 }
0x1018   :  { %v1516_v63 = vsub.f32 %v1506_v22, %v1514_v55 }
0x1019   :  { %v1513_v1 = vpop.xlane.xlu1 %1512 }
0x101a   :  { %v1515_v59 = vmul.f32 0.015625, %v1513_v1  ;;  %v1518_v31 = vmul.f32 %v1516_v63, %v1516_v63 }
0x101c   :  { %v1517_v3 = vsub.f32 %v1507_v57, %v1515_v59  ;;  %v1520_v61 = vsel %vm45_vm0, %v1518_v31, 0.0 }
0x101d   :  { %1521 = vadd.xlane.f32.xlu0 %v1520_v61 }
0x101e   :  { %v1519_v44 = vmul.f32 %v1517_v3, %v1517_v3 }
0x1020   :  { %v1523_v32 = vsel %vm45_vm0, %v1519_v44, 0.0 }
0x1021   :  { %1524 = vadd.xlane.f32.xlu1 %v1523_v32 }
0x1033   :  { %1699 = vrot.lane.b32.xlu0 %v1697_v40, %s3976_s24 }
0x10a6   :  { %v1522_v41 = vpop.xlane.xlu0 %1521 }
0x10a7   :  { %v1526_v42 = vmul.f32 0.015625, %v1522_v41 }
0x10a9   :  { %v1528_v43 = vadd.f32 1e-12, %v1526_v42 }
0x10aa   :  { %v1525_v46 = vpop.xlane.xlu1 %1524  ;;  %v1700_v10 = vpop.permute.xlu0 %1699 }
0x10ab   :  { %3921 = vrsqrt.f32 %v1528_v43  ;;  %v1527_v49 = vmul.f32 0.015625, %v1525_v46 }
0x10ad   :  { %v1529_v51 = vadd.f32 1e-12, %v1527_v49 }
0x10af   :  { %3923 = vrsqrt.f32 %v1529_v51 }
0x10b8   :  { %v3922_v53 = vpop.eup %3921 }
0x10b9   :  { %v1532_v58 = vmul.f32 %v3922_v53, %v1516_v63 }
0x10bb   :  { %v1538_v25 = vmul.f32 %v1537_v60, %v1532_v58 }
0x10bc   :  { %v3924_v2 = vpop.eup %3923 }
0x10bd   :  { %v1533_v4 = vmul.f32 %v3924_v2, %v1517_v3  ;;  %v4449_v15 = vadd.f32 %v3234_v26, %v1538_v25 }
0x10bf   :  { %v1539_v5 = vmul.f32 %v1537_v60, %v1533_v4 }
0x10c1   :  { %v4451_v6 = vadd.f32 %v3234_v26, %v1539_v5 }
0x10c3   :  { %v1595_v9 = vpack.c.bf16 %v4451_v6, %v4449_v15 }
0x10c5   :  { %3286 = vmatmul.mubr.msk.bf16.vlgmr.msra.gmra.mxu1 %vm45_vm0, %v1595_v9 }
0x10c6   :  { %3607 = vmatprep.mubr.msk.bf16.mxu1 %vm3978_vm1, %v3977_v47 }
0x1185   :  { %v1673_v12 = vpop.f32.mrf.mxu1 }
0x1186   :  { %v1702_v13 = vadd.f32 %v1700_v10, %v1673_v12  ;;  %v1686_v28 = vadd.f32 %v1685_v48, %v1673_v12 }
0x1187   :  { %v1675_v16 = vpop.f32.mrf.mxu1 }
0x1188   :  { %v4461_v18 = vpack.c.bf16 %v1702_v13, %v1702_v13  ;;  %v1712_v17 = vadd.f32 %v1711_v11, %v1675_v16  ;;  %v4478_v54 = vpack.c.bf16 %v1686_v28, %v1686_v28 }
0x1189   :  { %v1677_v20 = vpop.f32.mrf.mxu1 }
0x118a   :  { %v4463_v21 = vpack.c.bf16 %v1712_v17, %v1712_v17  ;;  %v1703_v14 = vadd.f32 %v1700_v10, %v1677_v20  ;;  %1721 = vrot.lane.b32.xlu1 %v4461_v18, %s3976_s24  ;;  %v1687_v34 = vadd.f32 %v1685_v48, %v1677_v20 }
0x118b   :  { %v1679_v29 = vpop.f32.mrf.mxu1 }
0x118c   :  { %v4467_v19 = vpack.c.bf16 %v1703_v14, %v1703_v14  ;;  %v1848_v22 = vsel %vm382_vm2, %v4463_v21, 0  ;;  %v1713_v30 = vadd.f32 %v1711_v11, %v1679_v29  ;;  %v4488_v1 = vpack.c.bf16 %v1687_v34, %v1687_v34 }
0x118d   :  { %3618 = vmatpush3.bf16.msra.mxu0 %v1848_v22 }
0x118e   :  { %1770 = vrot.lane.b32.xlu1 %v4467_v19, %s3976_s24  ;;  %3629 = vmatprep.subr.bf16.mxu0 %v3977_v47  ;;  %v4486_v63 = vpack.c.bf16 %v1713_v30, %v1713_v30 }
0x1190   :  { %v1894_v59 = vsel %vm382_vm2, %v4486_v63, 0 }
0x11fc   :  { %v1722_v23 = vpop.permute.xlu1 %1721 }
0x11fd   :  { %v1727_v27 = vsel %vm256_vm3, %v1722_v23, 0 }
0x11fe   :  { %3606 = vmatpush3.bf16.xpose.msra.mxu1 %v1727_v27 }
0x11ff   :  { %3611 = vmatprep.subr.bf16.mxu1 %v3977_v47 }
0x1200   :  { %v1771_v57 = vpop.permute.xlu1 %1770 }
0x1201   :  { %v1776_v55 = vsel %vm256_vm3, %v1771_v57, 0 }
0x1205   :  { %3608 = vmatmul.mubr.msk.bf16.vlgmr.msra.gmra.mxu1 %vm256_vm3, %v4478_v54 }
0x1206   :  { %3612 = vmatpush3.bf16.xpose.msra.mxu1 %v1776_v55  ;;  %3613 = vmatprep.mubr.msk.bf16.mxu1 %vm3978_vm1, %v3977_v47 }
0x1207   :  { %3623 = vmatprep.subr.bf16.mxu1 %v3977_v47 }
0x120d   :  { %3614 = vmatmul.mubr.msk.bf16.vlgmr.msra.gmra.mxu1 %vm256_vm3, %v4488_v1 }
0x120e   :  { %3624 = vmatpush3.bf16.msra.mxu1 %v1894_v59  ;;  %3625 = vmatprep.mubr.msk.bf16.mxu1 %vm3978_vm1, %v3977_v47 }
0x120f   :  { %3635 = vmatprep.subr.bf16.mxu1 %v3977_v47 }
0x12c5   :  { %v1763_v31 = vpop.f32.mrf.mxu1 }
0x12c6   :  { %v1818_v3 = vmul.f32 0.25, %v1763_v31 }
0x12c7   :  { %v3609_v61 = vpop.f32.mrf.mxu1 }
0x12c8   :  { %v1820_v44 = vsel %vm354_vm4, %v1818_v3, -inf }
0x12c9   :  { %1821 = vmax.xlane.f32.xlu1 %v1820_v44  ;;  %v1766_v32 = vpop.f32.mrf.mxu1 }
0x12cb   :  { %v3610_v0 = vpop.f32.mrf.mxu1 }
0x12cd   :  { %v1812_v33 = vpop.f32.mrf.mxu1 }
0x12ce   :  { %v1819_v45 = vmul.f32 0.25, %v1812_v33 }
0x12cf   :  { %v3615_v35 = vpop.f32.mrf.mxu1 }
0x12d0   :  { %v1823_v36 = vsel %vm354_vm4, %v1819_v45, -inf }
0x12d1   :  { %1824 = vmax.xlane.f32.xlu0 %v1823_v36  ;;  %v1815_v37 = vpop.f32.mrf.mxu1 }
0x12d3   :  { %v3616_v7 = vpop.f32.mrf.mxu1 }
0x12da   :  { %1938 = vrot.lane.b32.xlu1 %v4461_v18, %s3979_s1 }
0x12de   :  { %1936 = vrot.lane.b32.xlu1 %v4478_v54, %s3980_s26 }
0x12e2   :  { %1986 = vrot.lane.b32.xlu1 %v4488_v1, %s3980_s26 }
0x1352   :  { %v1822_v38 = vpop.xlane.xlu1 %1821 }
0x1353   :  { %v1826_v40 = vsub.f32 %v1818_v3, %v1822_v38 }
0x1355   :  { %v1828_v41 = vmul.f32 1.442695, %v1826_v40 }
0x1356   :  { %v1939_v26 = vpop.permute.xlu1 %1938 }
0x1357   :  { %3925 = vpow2.f32 %v1828_v41  ;;  %v1944_v9 = vsel %vm256_vm3, %v1939_v26, 0 }
0x135a   :  { %v1825_v42 = vpop.xlane.xlu0 %1824  ;;  %v1937_v16 = vpop.permute.xlu1 %1936 }
0x135b   :  { %v1827_v43 = vsub.f32 %v1819_v45, %v1825_v42 }
0x135d   :  { %v1830_v46 = vmul.f32 1.442695, %v1827_v43 }
0x135e   :  { %v1987_v20 = vpop.permute.xlu1 %1986 }
0x135f   :  { %3927 = vpow2.f32 %v1830_v46 }
0x1364   :  { %v3926_v49 = vpop.eup %3925 }
0x1365   :  { %v1832_v51 = vsel %vm354_vm4, %v3926_v49, 0.0 }
0x1366   :  { %1833 = vadd.xlane.f32.xlu0 %v1832_v51 }
0x136c   :  { %v3928_v53 = vpop.eup %3927 }
0x136d   :  { %v1835_v58 = vsel %vm354_vm4, %v3928_v53, 0.0 }
0x136e   :  { %1836 = vadd.xlane.f32.xlu0 %v1835_v58 }
0x1384   :  { %1988 = vrot.lane.b32.xlu0 %v4467_v19, %s3979_s1 }
0x13ef   :  { %v1834_v60 = vpop.xlane.xlu0 %1833 }
0x13f0   :  { %3929 = vrcp.f32 %v1834_v60 }
0x13f7   :  { %v1837_v2 = vpop.xlane.xlu0 %1836 }
0x13f8   :  { %3931 = vrcp.f32 %v1837_v2 }
0x13fb   :  { %v1989_v12 = vpop.permute.xlu0 %1988 }
0x13fc   :  { %v1994_v17 = vsel %vm256_vm3, %v1989_v12, 0 }
0x13fd   :  { %v3930_v4 = vpop.eup %3929 }
0x13fe   :  { %v1840_v25 = vmul.f32 %v3930_v4, %v3926_v49 }
0x1400   :  { %v1842_v5 = vpack.c.bf16 %v1840_v25, %v1840_v25 }
0x1402   :  { %3620 = vmatmul.mubr.msk.bf16.vlgmr.msra.gmra.mxu0 %vm354_vm4, %v1842_v5 }
0x1403   :  { %3630 = vmatpush3.bf16.xpose.msra.mxu0 %v1944_v9  ;;  %3631 = vmatprep.mubr.msk.bf16.mxu0 %vm3978_vm1, %v3977_v47 }
0x1404   :  { %3641 = vmatprep.subr.bf16.mxu0 %v3977_v47 }
0x1405   :  { %v3932_v10 = vpop.eup %3931 }
0x1406   :  { %v1841_v11 = vmul.f32 %v3932_v10, %v3928_v53 }
0x1408   :  { %v1843_v13 = vpack.c.bf16 %v1841_v11, %v1841_v11 }
0x140a   :  { %3626 = vmatmul.mubr.msk.bf16.vlgmr.msra.gmra.mxu1 %vm354_vm4, %v1843_v13  ;;  %3632 = vmatmul.mubr.msk.bf16.vlgmr.msra.gmra.mxu0 %vm256_vm3, %v1937_v16 }
0x140b   :  { %3636 = vmatpush3.bf16.xpose.msra.mxu1 %v1994_v17  ;;  %3637 = vmatprep.mubr.msk.bf16.mxu1 %vm3978_vm1, %v3977_v47 }
0x140c   :  { %3647 = vmatprep.subr.bf16.mxu1 %v3977_v47  ;;  %3643 = vmatprep.mubr.msk.bf16.mxu0 %vm3978_vm1, %v3977_v47 }
0x1412   :  { %3638 = vmatmul.mubr.msk.bf16.vlgmr.msra.gmra.mxu1 %vm256_vm3, %v1987_v20 }
0x1413   :  { %3649 = vmatprep.mubr.msk.bf16.mxu1 %vm3978_vm1, %v3977_v47 }
0x14c2   :  { %v4525_v14 = vpop.f32.mrf.mxu0 }
0x14c4   :  { %v3621_v22 = vpop.f32.mrf.mxu0 }
0x14c6   :  { %v1887_v48 = vpop.f32.mrf.mxu0 }
0x14c8   :  { %v3622_v23 = vpop.f32.mrf.mxu0 }
0x14ca   :  { %v4527_v27 = vpop.f32.mrf.mxu1  ;;  %v1980_v28 = vpop.f32.mrf.mxu0 }
0x14cb   :  { %v2036_v29 = vmul.f32 0.25, %v1980_v28 }
0x14cc   :  { %v3627_v57 = vpop.f32.mrf.mxu1  ;;  %v3633_v30 = vpop.f32.mrf.mxu0 }
0x14cd   :  { %v2038_v55 = vsel %vm354_vm4, %v2036_v29, -inf }
0x14ce   :  { %v1933_v34 = vpop.f32.mrf.mxu1  ;;  %2039 = vmax.xlane.f32.xlu1 %v2038_v55  ;;  %v1983_v59 = vpop.f32.mrf.mxu0 }
0x14d0   :  { %v3628_v31 = vpop.f32.mrf.mxu1  ;;  %v3634_v3 = vpop.f32.mrf.mxu0 }
0x14d2   :  { %v2030_v61 = vpop.f32.mrf.mxu1 }
0x14d3   :  { %v2037_v44 = vmul.f32 0.25, %v2030_v61 }
0x14d4   :  { %v3639_v32 = vpop.f32.mrf.mxu1 }
0x14d5   :  { %v2041_v0 = vsel %vm354_vm4, %v2037_v44, -inf }
0x14d6   :  { %2042 = vmax.xlane.f32.xlu0 %v2041_v0  ;;  %v2033_v33 = vpop.f32.mrf.mxu1 }
0x14d8   :  { %v3640_v45 = vpop.f32.mrf.mxu1 }
0x14df   :  { %2062 = vrot.lane.b32.xlu1 %v4463_v21, %s3980_s26 }
0x14e3   :  { %2160 = vrot.lane.b32.xlu1 %v4461_v18, %s3981_s27 }
0x14e7   :  { %2210 = vrot.lane.b32.xlu1 %v4467_v19, %s3981_s27 }
0x14eb   :  { %2158 = vrot.lane.b32.xlu1 %v4478_v54, %s3982_s28 }
0x1557   :  { %v2040_v35 = vpop.xlane.xlu1 %2039 }
0x1558   :  { %v2044_v36 = vsub.f32 %v2036_v29, %v2040_v35 }
0x155a   :  { %v2046_v37 = vmul.f32 1.442695, %v2044_v36 }
0x155b   :  { %v2063_v7 = vpop.permute.xlu1 %2062 }
0x155c   :  { %3933 = vpow2.f32 %v2046_v37  ;;  %v2068_v38 = vsel %vm382_vm2, %v2063_v7, 0 }
0x155d   :  { %3642 = vmatpush3.bf16.msra.mxu0 %v2068_v38 }
0x155e   :  { %3653 = vmatprep.subr.bf16.mxu0 %v3977_v47 }
0x155f   :  { %v2043_v40 = vpop.xlane.xlu0 %2042  ;;  %v2161_v25 = vpop.permute.xlu1 %2160 }
0x1560   :  { %v2045_v41 = vsub.f32 %v2037_v44, %v2043_v40  ;;  %v2166_v9 = vsel %vm256_vm3, %v2161_v25, 0 }
0x1562   :  { %v2048_v42 = vmul.f32 1.442695, %v2045_v41 }
0x1563   :  { %v2211_v10 = vpop.permute.xlu1 %2210 }
0x1564   :  { %3935 = vpow2.f32 %v2048_v42  ;;  %v2216_v17 = vsel %vm256_vm3, %v2211_v10, 0 }
0x1567   :  { %v2159_v16 = vpop.permute.xlu1 %2158 }
0x1569   :  { %v3934_v43 = vpop.eup %3933 }
0x156a   :  { %v2050_v46 = vsel %vm354_vm4, %v3934_v43, 0.0 }
0x156b   :  { %2051 = vadd.xlane.f32.xlu0 %v2050_v46 }
0x1571   :  { %v3936_v49 = vpop.eup %3935 }
0x1572   :  { %v2053_v51 = vsel %vm354_vm4, %v3936_v49, 0.0 }
0x1573   :  { %2054 = vadd.xlane.f32.xlu0 %v2053_v51 }
0x1589   :  { %2110 = vrot.lane.b32.xlu0 %v4486_v63, %s3980_s26 }
0x158d   :  { %2208 = vrot.lane.b32.xlu0 %v4488_v1, %s3982_s28 }
0x15f4   :  { %v2052_v53 = vpop.xlane.xlu0 %2051 }
0x15f5   :  { %3937 = vrcp.f32 %v2052_v53 }
0x15fc   :  { %v2055_v58 = vpop.xlane.xlu0 %2054 }
0x15fd   :  { %3939 = vrcp.f32 %v2055_v58 }
0x1600   :  { %v2111_v60 = vpop.permute.xlu0 %2110 }
0x1601   :  { %v2116_v2 = vsel %vm382_vm2, %v2111_v60, 0 }
0x1602   :  { %v3938_v4 = vpop.eup %3937  ;;  %3648 = vmatpush3.bf16.msra.mxu1 %v2116_v2 }
0x1603   :  { %v2058_v26 = vmul.f32 %v3938_v4, %v3934_v43  ;;  %3659 = vmatprep.subr.bf16.mxu1 %v3977_v47 }
0x1604   :  { %v2209_v20 = vpop.permute.xlu0 %2208 }
0x1605   :  { %v2060_v5 = vpack.c.bf16 %v2058_v26, %v2058_v26 }
0x1607   :  { %3644 = vmatmul.mubr.msk.bf16.vlgmr.msra.gmra.mxu0 %vm354_vm4, %v2060_v5 }
0x1608   :  { %3654 = vmatpush3.bf16.xpose.msra.mxu0 %v2166_v9  ;;  %3655 = vmatprep.mubr.msk.bf16.mxu0 %vm3978_vm1, %v3977_v47 }
0x1609   :  { %3665 = vmatprep.subr.bf16.mxu0 %v3977_v47 }
0x160a   :  { %v3940_v11 = vpop.eup %3939 }
0x160b   :  { %v2059_v12 = vmul.f32 %v3940_v11, %v3936_v49 }
0x160d   :  { %v2061_v13 = vpack.c.bf16 %v2059_v12, %v2059_v12 }
0x160f   :  { %3650 = vmatmul.mubr.msk.bf16.vlgmr.msra.gmra.mxu1 %vm354_vm4, %v2061_v13  ;;  %3656 = vmatmul.mubr.msk.bf16.vlgmr.msra.gmra.mxu0 %vm256_vm3, %v2159_v16 }
0x1610   :  { %3660 = vmatpush3.bf16.xpose.msra.mxu1 %v2216_v17  ;;  %3661 = vmatprep.mubr.msk.bf16.mxu1 %vm3978_vm1, %v3977_v47 }
0x1611   :  { %3671 = vmatprep.subr.bf16.mxu1 %v3977_v47  ;;  %3667 = vmatprep.mubr.msk.bf16.mxu0 %vm3978_vm1, %v3977_v47 }
0x1617   :  { %3662 = vmatmul.mubr.msk.bf16.vlgmr.msra.gmra.mxu1 %vm256_vm3, %v2209_v20 }
0x1618   :  { %3673 = vmatprep.mubr.msk.bf16.mxu1 %vm3978_vm1, %v3977_v47 }
0x16c7   :  { %v4565_v22 = vpop.f32.mrf.mxu0 }
0x16c9   :  { %v3645_v48 = vpop.f32.mrf.mxu0 }
0x16cb   :  { %v2107_v23 = vpop.f32.mrf.mxu0 }
0x16cd   :  { %v3646_v28 = vpop.f32.mrf.mxu0 }
0x16cf   :  { %v4567_v29 = vpop.f32.mrf.mxu1  ;;  %v2202_v57 = vpop.f32.mrf.mxu0 }
0x16d0   :  { %v3794_v30 = vpack.i.bf16 %v4567_v29, %v4565_v22  ;;  %v2258_v55 = vmul.f32 0.25, %v2202_v57 }
0x16d1   :  { %v3651_v34 = vpop.f32.mrf.mxu1  ;;  %v3657_v59 = vpop.f32.mrf.mxu0 }
0x16d2   :  { %v2260_v31 = vsel %vm354_vm4, %v2258_v55, -inf }
0x16d3   :  { %v2155_v3 = vpop.f32.mrf.mxu1  ;;  %2261 = vmax.xlane.f32.xlu1 %v2260_v31  ;;  %v2205_v61 = vpop.f32.mrf.mxu0 }
0x16d5   :  { %v3652_v44 = vpop.f32.mrf.mxu1  ;;  %v3658_v32 = vpop.f32.mrf.mxu0 }
0x16d7   :  { %v2252_v0 = vpop.f32.mrf.mxu1 }
0x16d8   :  { %v2259_v33 = vmul.f32 0.25, %v2252_v0 }
0x16d9   :  { %v3663_v45 = vpop.f32.mrf.mxu1 }
0x16da   :  { %v2263_v35 = vsel %vm354_vm4, %v2259_v33, -inf }
0x16db   :  { %2264 = vmax.xlane.f32.xlu0 %v2263_v35  ;;  %v2255_v36 = vpop.f32.mrf.mxu1 }
0x16dd   :  { %v3664_v37 = vpop.f32.mrf.mxu1 }
0x16e4   :  { %2284 = vrot.lane.b32.xlu1 %v4463_v21, %s3982_s28 }
0x16e8   :  { %2382 = vrot.lane.b32.xlu1 %v4461_v18, %s3983_s29 }
0x16ec   :  { %2432 = vrot.lane.b32.xlu1 %v4467_v19, %s3983_s29 }
0x16f0   :  { %2380 = vrot.lane.b32.xlu1 %v4478_v54, %s3984_s30 }
0x175c   :  { %v2262_v7 = vpop.xlane.xlu1 %2261 }
0x175d   :  { %v2266_v38 = vsub.f32 %v2258_v55, %v2262_v7 }
0x175f   :  { %v2268_v40 = vmul.f32 1.442695, %v2266_v38 }
0x1760   :  { %v2285_v41 = vpop.permute.xlu1 %2284 }
0x1761   :  { %3941 = vpow2.f32 %v2268_v40  ;;  %v2290_v42 = vsel %vm382_vm2, %v2285_v41, 0 }
0x1762   :  { %3666 = vmatpush3.bf16.msra.mxu0 %v2290_v42 }
0x1763   :  { %3677 = vmatprep.subr.bf16.mxu0 %v3977_v47 }
0x1764   :  { %v2265_v43 = vpop.xlane.xlu0 %2264  ;;  %v2383_v25 = vpop.permute.xlu1 %2382 }
0x1765   :  { %v2267_v46 = vsub.f32 %v2259_v33, %v2265_v43  ;;  %v2388_v9 = vsel %vm256_vm3, %v2383_v25, 0 }
0x1767   :  { %v2270_v49 = vmul.f32 1.442695, %v2267_v46 }
0x1768   :  { %v2433_v10 = vpop.permute.xlu1 %2432 }
0x1769   :  { %3943 = vpow2.f32 %v2270_v49  ;;  %v2438_v16 = vsel %vm256_vm3, %v2433_v10, 0  ;;  %v3851_v10 = vld [vmem:[%s4799_s3 + $0x28] sm:$0xff]  }
0x176c   :  { %v2381_v13 = vpop.permute.xlu1 %2380 }
0x176e   :  { %v3942_v18 = vpop.eup %3941 }
0x176f   :  { %v2272_v19 = vsel %vm354_vm4, %v3942_v18, 0.0 }
0x1770   :  { %2273 = vadd.xlane.f32.xlu0 %v2272_v19 }
0x1776   :  { %v3944_v51 = vpop.eup %3943 }
0x1777   :  { %v2275_v54 = vsel %vm354_vm4, %v3944_v51, 0.0 }
0x1778   :  { %2276 = vadd.xlane.f32.xlu0 %v2275_v54 }
0x178e   :  { %2332 = vrot.lane.b32.xlu0 %v4486_v63, %s3982_s28 }
0x1792   :  { %2430 = vrot.lane.b32.xlu0 %v4488_v1, %s3984_s30 }
0x17f9   :  { %v2274_v53 = vpop.xlane.xlu0 %2273 }
0x17fa   :  { %3945 = vrcp.f32 %v2274_v53 }
0x1801   :  { %v2277_v58 = vpop.xlane.xlu0 %2276 }
0x1802   :  { %3947 = vrcp.f32 %v2277_v58 }
0x1805   :  { %v2333_v60 = vpop.permute.xlu0 %2332 }
0x1806   :  { %v2338_v2 = vsel %vm382_vm2, %v2333_v60, 0 }
0x1807   :  { %v3946_v4 = vpop.eup %3945  ;;  %3672 = vmatpush3.bf16.msra.mxu1 %v2338_v2 }
0x1808   :  { %v2280_v26 = vmul.f32 %v3946_v4, %v3942_v18  ;;  %3683 = vmatprep.subr.bf16.mxu1 %v3977_v47 }
0x1809   :  { %v2431_v17 = vpop.permute.xlu0 %2430 }
0x180a   :  { %v2282_v5 = vpack.c.bf16 %v2280_v26, %v2280_v26 }
0x180c   :  { %3668 = vmatmul.mubr.msk.bf16.vlgmr.msra.gmra.mxu0 %vm354_vm4, %v2282_v5  ;;  %v3849_v5 = vld [vmem:[%s4799_s3 + $0x38] sm:$0xff]  }
0x180d   :  { %3678 = vmatpush3.bf16.xpose.msra.mxu0 %v2388_v9  ;;  %3679 = vmatprep.mubr.msk.bf16.mxu0 %vm3978_vm1, %v3977_v47  ;;  %v3850_v9 = vld [vmem:[%s4799_s3 + $0x30] sm:$0xff]  }
0x180e   :  { %3689 = vmatprep.subr.bf16.mxu0 %v3977_v47 }
0x180f   :  { %v3948_v1 = vpop.eup %3947 }
0x1810   :  { %v2281_v11 = vmul.f32 %v3948_v1, %v3944_v51  ;;  %v3852_v1 = vld [vmem:[%s4799_s3 + $0x20] sm:$0xff]  }
0x1812   :  { %v2283_v12 = vpack.c.bf16 %v2281_v11, %v2281_v11 }
0x1814   :  { %3674 = vmatmul.mubr.msk.bf16.vlgmr.msra.gmra.mxu1 %vm354_vm4, %v2283_v12  ;;  %3680 = vmatmul.mubr.msk.bf16.vlgmr.msra.gmra.mxu0 %vm256_vm3, %v2381_v13 }
0x1815   :  { %3684 = vmatpush3.bf16.xpose.msra.mxu1 %v2438_v16  ;;  %3685 = vmatprep.mubr.msk.bf16.mxu1 %vm3978_vm1, %v3977_v47 }
0x1816   :  { %3695 = vmatprep.subr.bf16.mxu1 %v3977_v47  ;;  %3691 = vmatprep.mubr.msk.bf16.mxu0 %vm3978_vm1, %v3977_v47 }
0x181c   :  { %3686 = vmatmul.mubr.msk.bf16.vlgmr.msra.gmra.mxu1 %vm256_vm3, %v2431_v17 }
0x181d   :  { %3697 = vmatprep.mubr.msk.bf16.mxu1 %vm3978_vm1, %v3977_v47 }
0x18cc   :  { %v2326_v20 = vpop.f32.mrf.mxu0 }
0x18ce   :  { %v3669_v48 = vpop.f32.mrf.mxu0 }
0x18d0   :  { %v2329_v23 = vpop.f32.mrf.mxu0 }
0x18d2   :  { %v3670_v28 = vpop.f32.mrf.mxu0 }
0x18d4   :  { %v2374_v57 = vpop.f32.mrf.mxu1  ;;  %v2424_v55 = vpop.f32.mrf.mxu0 }
0x18d5   :  { %v2480_v34 = vmul.f32 0.25, %v2424_v55  ;;  %v3799_v38 = vpack.i.bf16 %v2374_v57, %v2326_v20 }
0x18d6   :  { %v3675_v59 = vpop.f32.mrf.mxu1  ;;  %v3681_v31 = vpop.f32.mrf.mxu0 }
0x18d7   :  { %v2482_v3 = vsel %vm354_vm4, %v2480_v34, -inf }
0x18d8   :  { %v2377_v61 = vpop.f32.mrf.mxu1  ;;  %2483 = vmax.xlane.f32.xlu1 %v2482_v3  ;;  %v2427_v44 = vpop.f32.mrf.mxu0 }
0x18da   :  { %v3676_v32 = vpop.f32.mrf.mxu1  ;;  %v3682_v0 = vpop.f32.mrf.mxu0 }
0x18dc   :  { %v2474_v33 = vpop.f32.mrf.mxu1 }
0x18dd   :  { %v2481_v45 = vmul.f32 0.25, %v2474_v33 }
0x18de   :  { %v3687_v35 = vpop.f32.mrf.mxu1 }
0x18df   :  { %v2485_v36 = vsel %vm354_vm4, %v2481_v45, -inf }
0x18e0   :  { %2486 = vmax.xlane.f32.xlu0 %v2485_v36  ;;  %v2477_v37 = vpop.f32.mrf.mxu1 }
0x18e2   :  { %v3688_v7 = vpop.f32.mrf.mxu1 }
0x18e9   :  { %2506 = vrot.lane.b32.xlu1 %v4463_v21, %s3984_s30 }
0x18ed   :  { %3795 = vrot.lane.b32.xlu1 %v3794_v30, %s3983_s29 }
0x18f1   :  { %3800 = vrot.lane.b32.xlu1 %v3799_v38, %s3981_s27 }
0x1961   :  { %v2484_v40 = vpop.xlane.xlu1 %2483 }
0x1962   :  { %v2488_v41 = vsub.f32 %v2480_v34, %v2484_v40 }
0x1964   :  { %v2490_v42 = vmul.f32 1.442695, %v2488_v41 }
0x1965   :  { %v2507_v43 = vpop.permute.xlu1 %2506 }
0x1966   :  { %3949 = vpow2.f32 %v2490_v42  ;;  %v2512_v46 = vsel %vm382_vm2, %v2507_v43, 0 }
0x1967   :  { %3690 = vmatpush3.bf16.msra.mxu0 %v2512_v46 }
0x1968   :  { %3701 = vmatprep.subr.bf16.mxu0 %v3977_v47 }
0x1969   :  { %v2487_v49 = vpop.xlane.xlu0 %2486  ;;  %v3796_v57 = vpop.permute.xlu1 %3795 }
0x196a   :  { %v2489_v21 = vsub.f32 %v2481_v45, %v2487_v49  ;;  %v3798_v34 = vunpack.i.h.bf16 %v3796_v57  ;;  %v3797_v59 = vunpack.i.l.bf16 %v3796_v57 }
0x196c   :  { %v2492_v18 = vmul.f32 1.442695, %v2489_v21  ;;  %v2627_v44 = vsel %vm256_vm3, %v4527_v27, %v3798_v34  ;;  %v2626_v32 = vsel %vm256_vm3, %v4525_v14, %v3797_v59  ;;  %v2636_v14 = vrot.slane %v4438_v39, %v1173_v62  ;;  %v3861_v34 = vld [vmem:[%s4801_s5 + $0x58] sm:$0xff]   ;;  %v3862_v59 = vld [vmem:[%s4801_s5 + $0x50] sm:$0xff]  }
0x196d   :  { %v3801_v55 = vpop.permute.xlu1 %3800 }
0x196e   :  { %3951 = vpow2.f32 %v2492_v18  ;;  %v3803_v31 = vunpack.i.h.bf16 %v3801_v55  ;;  %v3802_v3 = vunpack.i.l.bf16 %v3801_v55  ;;  %v3860_v55 = vld [vmem:[%s4801_s5 + $0x60] sm:$0xff]  }
0x1970   :  { %v2628_v45 = vsel %vm1164_vm5, %v2626_v32, %v3802_v3  ;;  %v2629_v35 = vsel %vm1164_vm5, %v2627_v44, %v3803_v31  ;;  %v3863_v31 = vld [vmem:[%s4801_s5 + $0x48] sm:$0xff]   ;;  %v3864_v3 = vld [vmem:[%s4801_s5 + $0x40] sm:$0xff]  }
0x1973   :  { %v3950_v19 = vpop.eup %3949 }
0x1974   :  { %v2494_v22 = vsel %vm354_vm4, %v3950_v19, 0.0 }
0x1975   :  { %2495 = vadd.xlane.f32.xlu0 %v2494_v22 }
0x197b   :  { %v3952_v29 = vpop.eup %3951 }
0x197c   :  { %v2497_v30 = vsel %vm354_vm4, %v3952_v29, 0.0 }
0x197d   :  { %2498 = vadd.xlane.f32.xlu0 %v2497_v30 }
0x1993   :  { %2554 = vrot.lane.b32.xlu0 %v4486_v63, %s3984_s30 }
0x19fe   :  { %v2496_v51 = vpop.xlane.xlu0 %2495 }
0x19ff   :  { %3953 = vrcp.f32 %v2496_v51 }
0x1a06   :  { %v2499_v54 = vpop.xlane.xlu0 %2498 }
0x1a07   :  { %3955 = vrcp.f32 %v2499_v54 }
0x1a0a   :  { %v2555_v53 = vpop.permute.xlu0 %2554 }
0x1a0b   :  { %v2560_v58 = vsel %vm382_vm2, %v2555_v53, 0 }
0x1a0c   :  { %v3954_v60 = vpop.eup %3953  ;;  %3696 = vmatpush3.bf16.msra.mxu1 %v2560_v58 }
0x1a0d   :  { %v2502_v2 = vmul.f32 %v3954_v60, %v3950_v19  ;;  %3713 = vmatprep.subr.bf16.mxu1 %v3977_v47  ;;  %v3854_v60 = vld [vmem:[%s4800_s4 + $0x30] sm:$0xff]  }
0x1a0f   :  { %v2504_v4 = vpack.c.bf16 %v2502_v2, %v2502_v2  ;;  %v3855_v2 = vld [vmem:[%s4800_s4 + $0x28] sm:$0xff]  }
0x1a11   :  { %3692 = vmatmul.mubr.msk.bf16.vlgmr.msra.gmra.mxu0 %vm354_vm4, %v2504_v4  ;;  %v3856_v4 = vld [vmem:[%s4800_s4 + $0x20] sm:$0xff]  }
0x1a12   :  { %3709 = vmatprep.mubr.msk.bf16.mxu0 %vm3978_vm1, %v3977_v47  ;;  %3702 = vmatpush3.bf16.msra.mxu0 %v3849_v5 }
0x1a13   :  { %3703 = vmatprep.subr.bf16.mxu0 %v3977_v47 }
0x1a14   :  { %v3956_v25 = vpop.eup %3955 }
0x1a15   :  { %v2503_v63 = vmul.f32 %v3956_v25, %v3952_v29 }
0x1a16   :  { %3704 = vmatpush3.bf16.msra.mxu0 %v3850_v9 }
0x1a17   :  { %v2505_v26 = vpack.c.bf16 %v2503_v63, %v2503_v63  ;;  %3705 = vmatprep.subr.bf16.mxu0 %v3977_v47 }
0x1a19   :  { %3698 = vmatmul.mubr.msk.bf16.vlgmr.msra.gmra.mxu1 %vm354_vm4, %v2505_v26 }
0x1a1a   :  { %3721 = vmatprep.mubr.msk.bf16.mxu1 %vm3978_vm1, %v3977_v47  ;;  %3706 = vmatpush3.bf16.msra.mxu0 %v3851_v10 }
0x1a1b   :  { %3707 = vmatprep.subr.bf16.mxu0 %v3977_v47 }
0x1a1e   :  { %3708 = vmatpush3.bf16.msra.mxu0 %v3852_v1 }
0x1a1f   :  { %3725 = vmatprep.subr.bf16.mxu0 %v3977_v47 }
0x1ad1   :  { %v2548_v11 = vpop.f32.mrf.mxu0 }
0x1ad3   :  { %v3693_v12 = vpop.f32.mrf.mxu0 }
0x1ad4   :  { %v2736_v12 = vrot.slane %v4438_v39, %v1273_v8  ;;  %v3857_v8 = vld [vmem:[%s4801_s5 + $0x78] sm:$0xff]  }
0x1ad5   :  { %v2551_v13 = vpop.f32.mrf.mxu0 }
0x1ad7   :  { %v3694_v16 = vpop.f32.mrf.mxu0 }
0x1ad9   :  { %v2596_v17 = vpop.f32.mrf.mxu1 }
0x1ada   :  { %v3804_v20 = vpack.i.bf16 %v2596_v17, %v2548_v11 }
0x1adb   :  { %v3699_v48 = vpop.f32.mrf.mxu1 }
0x1adc   :  { %3805 = vrot.lane.b32.xlu1 %v3804_v20, %s3979_s1  ;;  %v2742_v20 = vrot.slane %v4438_v39, %v1279_v50  ;;  %v3858_v50 = vld [vmem:[%s4801_s5 + $0x70] sm:$0xff]   ;;  %v3859_v39 = vld [vmem:[%s4801_s5 + $0x68] sm:$0xff]  }
0x1add   :  { %v2599_v23 = vpop.f32.mrf.mxu1 }
0x1adf   :  { %v3700_v28 = vpop.f32.mrf.mxu1 }
0x1b4e   :  { %v3806_v61 = vpop.permute.xlu1 %3805 }
0x1b4f   :  { %v3808_v0 = vunpack.i.h.bf16 %v3806_v61  ;;  %v3807_v33 = vunpack.i.l.bf16 %v3806_v61  ;;  %v3314_v61 = vld [vmem:[%s4802_s7 + $0x1] ss:$0 sm:$0xff] }
0x1b51   :  { %v2631_v36 = vsel %vm1167_vm6, %v2629_v35, %v3808_v0  ;;  %v2630_v37 = vsel %vm1167_vm6, %v2628_v45, %v3807_v33 }
0x1b52   :  { %v2632_v7 = vpack.c.bf16 %v2631_v36, %v2630_v37 }
0x1b54   :  { %3710 = vmatmul.mubr.msk.bf16.vlgmr.msra.gmra.mxu0 %vm45_vm0, %v2632_v7 }
0x1b55   :  { %3741 = vmatprep.mubr.msk.bf16.mxu0 %vm3978_vm1, %v3977_v47  ;;  %3726 = vmatpush3.bf16.msra.mxu0 %v3857_v8 }
0x1b56   :  { %3727 = vmatprep.subr.bf16.mxu0 %v3977_v47 }
0x1b59   :  { %3728 = vmatpush3.bf16.msra.mxu0 %v3858_v50 }
0x1b5a   :  { %3729 = vmatprep.subr.bf16.mxu0 %v3977_v47 }
0x1b5d   :  { %3730 = vmatpush3.bf16.msra.mxu0 %v3859_v39 }
0x1b5e   :  { %3731 = vmatprep.subr.bf16.mxu0 %v3977_v47 }
0x1b61   :  { %3732 = vmatpush3.bf16.msra.mxu0 %v3860_v55 }
0x1b62   :  { %3733 = vmatprep.subr.bf16.mxu0 %v3977_v47 }
0x1b65   :  { %3734 = vmatpush3.bf16.msra.mxu0 %v3861_v34 }
0x1b66   :  { %3735 = vmatprep.subr.bf16.mxu0 %v3977_v47 }
0x1b69   :  { %3736 = vmatpush3.bf16.msra.mxu0 %v3862_v59 }
0x1b6a   :  { %3737 = vmatprep.subr.bf16.mxu0 %v3977_v47 }
0x1b6d   :  { %3738 = vmatpush3.bf16.msra.mxu0 %v3863_v31 }
0x1b6e   :  { %3739 = vmatprep.subr.bf16.mxu0 %v3977_v47 }
0x1b71   :  { %3740 = vmatpush3.bf16.msra.mxu0 %v3864_v3 }
0x1c14   :  { %v2698_v27 = vpop.f32.mrf.mxu0 }
0x1c15   :  { %v2699_v38 = vadd.f32 %v2698_v27, %v2636_v14 }
0x1c16   :  { %v3711_v40 = vpop.f32.mrf.mxu0 }
0x1c17   :  { %v2705_v41 = vadd.f32 %v2699_v38, %v4449_v15 }
0x1c18   :  { %v2701_v42 = vpop.f32.mrf.mxu0 }
0x1c19   :  { %v2702_v43 = vadd.f32 %v2701_v42, %v2636_v14  ;;  %v2707_v46 = vsel %vm45_vm0, %v2705_v41, 0.0 }
0x1c1a   :  { %2708 = vadd.xlane.f32.xlu0 %v2707_v46  ;;  %v3712_v49 = vpop.f32.mrf.mxu0 }
0x1c1b   :  { %v2706_v21 = vadd.f32 %v2702_v43, %v4451_v6  ;;  %v3853_v6 = vld [vmem:[%s4800_s4 + $0x38] sm:$0xff]  }
0x1c1c   :  { %3714 = vmatpush3.bf16.msra.mxu1 %v3853_v6 }
0x1c1d   :  { %v2710_v18 = vsel %vm45_vm0, %v2706_v21, 0.0  ;;  %3715 = vmatprep.subr.bf16.mxu1 %v3977_v47 }
0x1c1e   :  { %2711 = vadd.xlane.f32.xlu1 %v2710_v18 }
0x1c20   :  { %3716 = vmatpush3.bf16.msra.mxu1 %v3854_v60 }
0x1c21   :  { %3717 = vmatprep.subr.bf16.mxu1 %v3977_v47 }
0x1c24   :  { %3718 = vmatpush3.bf16.msra.mxu1 %v3855_v2 }
0x1c25   :  { %3719 = vmatprep.subr.bf16.mxu1 %v3977_v47 }
0x1c28   :  { %3720 = vmatpush3.bf16.msra.mxu1 %v3856_v4 }
0x1c29   :  { %3745 = vmatprep.subr.bf16.mxu1 %v3977_v47 }
0x1ca3   :  { %v2709_v19 = vpop.xlane.xlu0 %2708 }
0x1ca4   :  { %v2713_v22 = vmul.f32 0.015625, %v2709_v19 }
0x1ca6   :  { %v2715_v29 = vsub.f32 %v2705_v41, %v2713_v22 }
0x1ca7   :  { %v2712_v62 = vpop.xlane.xlu1 %2711 }
0x1ca8   :  { %v2714_v30 = vmul.f32 0.015625, %v2712_v62  ;;  %v2717_v51 = vmul.f32 %v2715_v29, %v2715_v29 }
0x1caa   :  { %v2716_v54 = vsub.f32 %v2706_v21, %v2714_v30  ;;  %v2719_v15 = vsel %vm45_vm0, %v2717_v51, 0.0 }
0x1cab   :  { %2720 = vadd.xlane.f32.xlu0 %v2719_v15 }
0x1cac   :  { %v2718_v53 = vmul.f32 %v2716_v54, %v2716_v54 }
0x1cae   :  { %v2722_v58 = vsel %vm45_vm0, %v2718_v53, 0.0 }
0x1caf   :  { %2723 = vadd.xlane.f32.xlu0 %v2722_v58 }
0x1d34   :  { %v2721_v25 = vpop.xlane.xlu0 %2720 }
0x1d35   :  { %v2725_v63 = vmul.f32 0.015625, %v2721_v25 }
0x1d37   :  { %v2727_v26 = vadd.f32 1e-12, %v2725_v63 }
0x1d38   :  { %v2724_v5 = vpop.xlane.xlu0 %2723 }
0x1d39   :  { %3957 = vrsqrt.f32 %v2727_v26  ;;  %v2726_v9 = vmul.f32 0.015625, %v2724_v5 }
0x1d3b   :  { %v2728_v10 = vadd.f32 1e-12, %v2726_v9 }
0x1d3d   :  { %3959 = vrsqrt.f32 %v2728_v10 }
0x1d46   :  { %v3958_v1 = vpop.eup %3957 }
0x1d47   :  { %v2731_v11 = vmul.f32 %v3958_v1, %v2715_v29 }
0x1d49   :  { %v2737_v17 = vmul.f32 %v2736_v12, %v2731_v11 }
0x1d4a   :  { %v3960_v13 = vpop.eup %3959 }
0x1d4b   :  { %v2732_v16 = vmul.f32 %v3960_v13, %v2716_v54  ;;  %v4689_v23 = vadd.f32 %v2742_v20, %v2737_v17 }
0x1d4d   :  { %v2738_v48 = vmul.f32 %v2736_v12, %v2732_v16 }
0x1d4f   :  { %v4691_v28 = vadd.f32 %v2742_v20, %v2738_v48 }
0x1d51   :  { %v2745_v57 = vpack.c.bf16 %v4691_v28, %v4689_v23 }
0x1d53   :  { %3722 = vmatmul.mubr.msk.bf16.vlgmr.msra.gmra.mxu1 %vm45_vm0, %v2745_v57 }
0x1d54   :  { %3753 = vmatprep.mubr.msk.bf16.mxu1 %vm3978_vm1, %v3977_v47 }
0x1e13   :  { %v2813_v44 = vpop.f32.mrf.mxu1 }
0x1e14   :  { %v2814_v32 = vadd.f32 %v3314_v61, %v2813_v44 }
0x1e15   :  { %v3723_v0 = vpop.f32.mrf.mxu1 }
0x1e16   :  { %v2822_v33 = vmul.f32 0.70710677, %v2814_v32  ;;  %v2820_v39 = vmul.f32 0.5, %v2814_v32 }
0x1e17   :  { %v2816_v45 = vpop.f32.mrf.mxu1 }
0x1e18   :  { %v2824_v35 = vand.u32 2147483647, %v2822_v33  ;;  %v2817_v36 = vadd.f32 %v3314_v61, %v2816_v45  ;;  %vm2864_vm9 = vcmp.lt.f32.partialorder %v2822_v33, 0.0  ;;  %v3974_v61 = vld [vmem:[%s4797_s6 + $0x10] sm:$0xff] }
0x1e19   :  { %v3724_v37 = vpop.f32.mrf.mxu1  ;;  %v2878_v44 = vrot.slane %v3974_v61, %v1415_v56 }
0x1e1a   :  { %v2826_v7 = vmul.f32 0.3275911, %v2824_v35  ;;  %v2823_v14 = vmul.f32 0.70710677, %v2817_v36  ;;  %v2852_v42 = vsub.f32 0.0, %v2824_v35  ;;  %v2821_v55 = vmul.f32 0.5, %v2817_v36 }
0x1e1c   :  { %v2828_v27 = vadd.f32 1.0, %v2826_v7  ;;  %v2825_v38 = vand.u32 2147483647, %v2823_v14  ;;  %v2854_v43 = vmul.f32 %v2852_v42, %v2824_v35  ;;  %vm2865_vm10 = vcmp.lt.f32.partialorder %v2823_v14, 0.0 }
0x1e1e   :  { %3961 = vrcp.f32 %v2828_v27  ;;  %v2827_v40 = vmul.f32 0.3275911, %v2825_v38  ;;  %v2853_v46 = vsub.f32 0.0, %v2825_v38  ;;  %v2856_v18 = vmul.f32 1.442695, %v2854_v43 }
0x1e20   :  { %v2829_v41 = vadd.f32 1.0, %v2827_v40  ;;  %v2855_v19 = vmul.f32 %v2853_v46, %v2825_v38 }
0x1e22   :  { %3963 = vrcp.f32 %v2829_v41  ;;  %v2858_v51 = vmul.f32 1.442695, %v2855_v19  ;;  %v3867_v19 = vld [vmem:[%s4803_s8 + $0x8] sm:$0xff]  }
0x1e23   :  { %3965 = vpow2.f32 %v2856_v18  ;;  %v3866_v18 = vld [vmem:[%s4803_s8 + $0x10] sm:$0xff]  }
0x1e24   :  { %3967 = vpow2.f32 %v2858_v51 }
0x1e2b   :  { %v3962_v49 = vpop.eup %3961 }
0x1e2c   :  { %v2834_v21 = vmul.f32 1.0614054, %v3962_v49 }
0x1e2e   :  { %v2836_v22 = vadd.f32 -1.4531521, %v2834_v21 }
0x1e2f   :  { %v3964_v29 = vpop.eup %3963 }
0x1e30   :  { %v2838_v62 = vmul.f32 %v3962_v49, %v2836_v22  ;;  %v2835_v30 = vmul.f32 1.0614054, %v3964_v29  ;;  %v3966_v9 = vpop.eup %3965  ;;  %v3868_v22 = vld [vmem:[%s4803_s8] sm:$0xff]  }
0x1e31   :  { %v3968_v13 = vpop.eup %3967 }
0x1e32   :  { %v2840_v54 = vadd.f32 1.4214138, %v2838_v62  ;;  %v2837_v15 = vadd.f32 -1.4531521, %v2835_v30 }
0x1e34   :  { %v2842_v53 = vmul.f32 %v3962_v49, %v2840_v54  ;;  %v2839_v58 = vmul.f32 %v3964_v29, %v2837_v15 }
0x1e36   :  { %v2844_v6 = vadd.f32 -0.28449672, %v2842_v53  ;;  %v2841_v60 = vadd.f32 1.4214138, %v2839_v58 }
0x1e38   :  { %v2846_v2 = vmul.f32 %v3962_v49, %v2844_v6  ;;  %v2843_v4 = vmul.f32 %v3964_v29, %v2841_v60  ;;  %v2999_v6 = vrot.slane %v3974_v61, %v1536_v52  ;;  %v3871_v52 = vld [vmem:[%s4804_s10 + $0x8] sm:$0xff]  }
0x1e3a   :  { %v2848_v25 = vadd.f32 0.2548296, %v2846_v2  ;;  %v2845_v63 = vadd.f32 -0.28449672, %v2843_v4 }
0x1e3c   :  { %v2850_v26 = vmul.f32 %v3962_v49, %v2848_v25  ;;  %v2847_v5 = vmul.f32 %v3964_v29, %v2845_v63  ;;  %v3328_v25 = vld [vmem:[%s4797_s6 + $0x18] ss:$0 sm:$0xff] }
0x1e3e   :  { %v2860_v10 = vmul.f32 %v3966_v9, %v2850_v26  ;;  %v2849_v1 = vadd.f32 0.2548296, %v2847_v5  ;;  %v3869_v9 = vld [vmem:[%s4804_s10 + $0x18] sm:$0xff]  }
0x1e40   :  { %v2862_v11 = vsub.f32 1.0, %v2860_v10  ;;  %v2851_v12 = vmul.f32 %v3964_v29, %v2849_v1  ;;  %v3872_v1 = vld [vmem:[%s4804_s10] sm:$0xff]  }
0x1e42   :  { %v2866_v16 = vsub.f32 0.0, %v2862_v11  ;;  %v2861_v17 = vmul.f32 %v3968_v13, %v2851_v12 }
0x1e44   :  { %v2868_v20 = vsel %vm2864_vm9, %v2866_v16, %v2862_v11  ;;  %v2863_v48 = vsub.f32 1.0, %v2861_v17  ;;  %v3329_v11 = vld [vmem:[%s4805_s9] ss:$0 sm:$0xff] }
0x1e45   :  { %v2870_v8 = vadd.f32 1.0, %v2868_v20 }
0x1e46   :  { %v2867_v57 = vsub.f32 0.0, %v2863_v48 }
0x1e47   :  { %v2872_v59 = vmul.f32 %v2870_v8, %v2820_v39 }
0x1e48   :  { %v2869_v50 = vsel %vm2865_vm10, %v2867_v57, %v2863_v48 }
0x1e49   :  { %v2871_v34 = vadd.f32 1.0, %v2869_v50 }
0x1e4b   :  { %v2873_v31 = vmul.f32 %v2871_v34, %v2821_v55 }
0x1e4d   :  { %v2874_v3 = vpack.c.bf16 %v2873_v31, %v2872_v59 }
0x1e4f   :  { %3742 = vmatmul.mubr.bf16.vlgmr.msra.gmra.mxu0 %v2874_v3 }
0x1f0f   :  { %v2961_v0 = vpop.f32.mrf.mxu0 }
0x1f10   :  { %v2962_v33 = vadd.f32 %v2961_v0, %v2878_v44 }
0x1f11   :  { %v3743_v45 = vpop.f32.mrf.mxu0 }
0x1f12   :  { %v2968_v35 = vadd.f32 %v2962_v33, %v4689_v23 }
0x1f13   :  { %v2964_v37 = vpop.f32.mrf.mxu0 }
0x1f14   :  { %v2965_v32 = vadd.f32 %v2964_v37, %v2878_v44  ;;  %v2970_v36 = vsel %vm45_vm0, %v2968_v35, 0.0 }
0x1f15   :  { %2971 = vadd.xlane.f32.xlu0 %v2970_v36  ;;  %v3744_v7 = vpop.f32.mrf.mxu0 }
0x1f16   :  { %v2969_v14 = vadd.f32 %v2965_v32, %v4691_v28  ;;  %v3865_v28 = vld [vmem:[%s4803_s8 + $0x18] sm:$0xff]  }
0x1f17   :  { %3746 = vmatpush3.bf16.msra.mxu1 %v3865_v28 }
0x1f18   :  { %v2973_v27 = vsel %vm45_vm0, %v2969_v14, 0.0  ;;  %3747 = vmatprep.subr.bf16.mxu1 %v3977_v47 }
0x1f19   :  { %2974 = vadd.xlane.f32.xlu1 %v2973_v27 }
0x1f1b   :  { %3748 = vmatpush3.bf16.msra.mxu1 %v3866_v18 }
0x1f1c   :  { %3749 = vmatprep.subr.bf16.mxu1 %v3977_v47 }
0x1f1f   :  { %3750 = vmatpush3.bf16.msra.mxu1 %v3867_v19 }
0x1f20   :  { %3751 = vmatprep.subr.bf16.mxu1 %v3977_v47 }
0x1f23   :  { %3752 = vmatpush3.bf16.msra.mxu1 %v3868_v22 }
0x1f24   :  { %3757 = vmatprep.subr.bf16.mxu1 %v3977_v47 }
0x1f9e   :  { %v2972_v38 = vpop.xlane.xlu0 %2971 }
0x1f9f   :  { %v2976_v40 = vmul.f32 0.015625, %v2972_v38 }
0x1fa1   :  { %v2978_v41 = vsub.f32 %v2968_v35, %v2976_v40 }
0x1fa2   :  { %v2975_v56 = vpop.xlane.xlu1 %2974 }
0x1fa3   :  { %v2977_v42 = vmul.f32 0.015625, %v2975_v56  ;;  %v2980_v43 = vmul.f32 %v2978_v41, %v2978_v41 }
0x1fa5   :  { %v2979_v46 = vsub.f32 %v2969_v14, %v2977_v42  ;;  %v2982_v23 = vsel %vm45_vm0, %v2980_v43, 0.0 }
0x1fa6   :  { %2983 = vadd.xlane.f32.xlu0 %v2982_v23 }
0x1fa7   :  { %v2981_v49 = vmul.f32 %v2979_v46, %v2979_v46 }
0x1fa9   :  { %v2985_v21 = vsel %vm45_vm0, %v2981_v49, 0.0 }
0x1faa   :  { %2986 = vadd.xlane.f32.xlu1 %v2985_v21 }
0x202f   :  { %v2984_v29 = vpop.xlane.xlu0 %2983 }
0x2030   :  { %v2988_v62 = vmul.f32 0.015625, %v2984_v29 }
0x2032   :  { %v2990_v30 = vadd.f32 1e-12, %v2988_v62 }
0x2033   :  { %v2987_v51 = vpop.xlane.xlu1 %2986 }
0x2034   :  { %3969 = vrsqrt.f32 %v2990_v30  ;;  %v2989_v54 = vmul.f32 0.015625, %v2987_v51 }
0x2036   :  { %v2991_v15 = vadd.f32 1e-12, %v2989_v54 }
0x2038   :  { %3971 = vrsqrt.f32 %v2991_v15 }
0x2041   :  { %v3970_v53 = vpop.eup %3969 }
0x2042   :  { %v2994_v58 = vmul.f32 %v3970_v53, %v2978_v41 }
0x2044   :  { %v3000_v4 = vmul.f32 %v2999_v6, %v2994_v58 }
0x2045   :  { %v3972_v60 = vpop.eup %3971 }
0x2046   :  { %v2995_v2 = vmul.f32 %v3972_v60, %v2979_v46  ;;  %v3006_v26 = vadd.f32 %v3328_v25, %v3000_v4 }
0x2048   :  { %v3001_v63 = vmul.f32 %v2999_v6, %v2995_v2 }
0x204a   :  { %v3007_v5 = vadd.f32 %v3328_v25, %v3001_v63 }
0x204c   :  { %v3008_v10 = vpack.c.bf16 %v3007_v5, %v3006_v26 }
0x204e   :  { %3754 = vmatmul.mubr.msk.bf16.vlgmr.msra.gmra.mxu1 %vm45_vm0, %v3008_v10 }
0x204f   :  { %3758 = vmatpush3.bf16.msra.mxu1 %v3869_v9  ;;  %3765 = vmatprep.mubr.msk.bf16.mxu1 %vm3978_vm1, %v3977_v47 }
0x2050   :  { %3759 = vmatprep.subr.bf16.mxu1 %v3977_v47 }
0x2053   :  { %3760 = vmatpush3.bf16.msra.mxu1 %v3870_v24 }
0x2054   :  { %3761 = vmatprep.subr.bf16.mxu1 %v3977_v47 }
0x2057   :  { %3762 = vmatpush3.bf16.msra.mxu1 %v3871_v52 }
0x2058   :  { %3763 = vmatprep.subr.bf16.mxu1 %v3977_v47  ;;  %v3335_v47 = vld [vmem:[%s4806_s11] ss:$0 sm:$0xff] }
0x205b   :  { %3764 = vmatpush3.bf16.msra.mxu1 %v3872_v1 }
0x210e   :  { %v3085_v12 = vpop.f32.mrf.mxu1 }
0x210f   :  { %v3086_v16 = vadd.f32 %v3329_v11, %v3085_v12 }
0x2110   :  { %v3755_v13 = vpop.f32.mrf.mxu1 }
0x2111   :  { %v3092_v57 = vmax.f32 %v3086_v16, 0.0 }
0x2112   :  { %v3088_v17 = vpop.f32.mrf.mxu1 }
0x2113   :  { %v3089_v20 = vadd.f32 %v3329_v11, %v3088_v17 }
0x2114   :  { %v3756_v48 = vpop.f32.mrf.mxu1 }
0x2115   :  { %v3093_v8 = vmax.f32 %v3089_v20, 0.0 }
0x2117   :  { %v3094_v50 = vpack.c.bf16 %v3093_v8, %v3092_v57 }
0x2119   :  { %3766 = vmatmul.mubr.msk.bf16.vlgmr.msra.gmra.mxu1 %vm45_vm0, %v3094_v50 }
0x21d9   :  { %v3171_v39 = vpop.f32.mrf.mxu1 }
0x21da   :  { %v3172_v55 = vadd.f32 %v3335_v47, %v3171_v39 }
0x21db   :  { %v3767_v34 = vpop.f32.mrf.mxu1 }
0x21dc   :  { %3178 = vst [vmem:[%s4807_s12] sm:$0xff] %v3172_v55 }
0x21dd   :  { %v3174_v59 = vpop.f32.mrf.mxu1 }
0x21de   :  { %v3175_v31 = vadd.f32 %v3335_v47, %v3174_v59 }
0x21df   :  { %v3768_v3 = vpop.f32.mrf.mxu1 }
0x21e0   :  { %3179 = vst [vmem:[%s4807_s12 + $0x8] sm:$0xff] %v3175_v31 }

</bundles_post_ra>
